<compile_context>
chip_gen: v7x
topology: tpu7x:2x2x1
jax: 0.10.0
libtpu: 0.0.40
codegen_flags: <defaults>
</compile_context>

<pallas_src>
import jax
import jax.numpy as jnp
from jax.experimental import pallas as pl
from jax.experimental.pallas import tpu as pltpu


def _round_up(x, m):
    return ((x + m - 1) // m) * m


# ----------------------------------------------------------------------------
# Generic row-tiled matmul + bias kernel (used for the hoisted LSTM input
# projection and for the final Linear layer).
# ----------------------------------------------------------------------------
def matmul_bias_kernel(x_ref, w_ref, b_ref, o_ref):
    o_ref[...] = (jnp.dot(x_ref[...], w_ref[...],
                          preferred_element_type=jnp.float32) + b_ref[...])


def matmul_bias(x, w, b, tm_max=512):
    """(M, K) @ (K, N) + b with row tiling and lane-dense (128-padded) output."""
    M, K = x.shape
    N = w.shape[1]
    # lane-dense output: pad N to a multiple of 128 (unmasked vst), slice after
    Np = _round_up(N, 128)
    if Np != N:
        w = jnp.pad(w, ((0, 0), (0, Np - N)))
        b = jnp.pad(b, ((0, Np - N),))
    tm = min(tm_max, _round_up(M, 8))
    Mp = _round_up(M, tm)
    if Mp != M:
        x = jnp.pad(x, ((0, Mp - M), (0, 0)))

    out = pl.pallas_call(
        matmul_bias_kernel,
        out_shape=jax.ShapeDtypeStruct((Mp, Np), jnp.float32),
        grid=(Mp // tm,),
        in_specs=[
            pl.BlockSpec((tm, K), lambda i: (i, 0)),
            pl.BlockSpec((K, Np), lambda i: (0, 0)),
            pl.BlockSpec((1, Np), lambda i: (0, 0)),
        ],
        out_specs=pl.BlockSpec((tm, Np), lambda i: (i, 0)),
        compiler_params=pltpu.CompilerParams(dimension_semantics=("parallel",)),
    )(x, w, b.reshape(1, Np))
    return out[:M, :N]


# ----------------------------------------------------------------------------
# CNN block kernel: Conv1d(k=3, pad=1) + BatchNorm1d(eval) + ReLU + MaxPool1d(2,2)
# fused; row-tiled over the (N*W2) output rows.
# ----------------------------------------------------------------------------
def cnn_block_kernel(x0_ref, x1_ref, w_ref, b_ref, scale_ref, shift_ref, o_ref):
    # x0_ref / x1_ref: (tm, 3*Cin) im2col rows for even / odd conv positions
    w = w_ref[...]
    y0 = jnp.dot(x0_ref[...], w, preferred_element_type=jnp.float32)
    y1 = jnp.dot(x1_ref[...], w, preferred_element_type=jnp.float32)

    def bn_relu(y):
        return jnp.maximum((y + b_ref[...]) * scale_ref[...] + shift_ref[...], 0.0)

    o_ref[...] = jnp.maximum(bn_relu(y0), bn_relu(y1))   # maxpool(kernel=2, stride=2)


def cnn_block(x, conv_w, conv_b, bn_scale, bn_shift, tm_max=512):
    # x: (batch, num_windows, Cin, W)  (PyTorch per-window NCW)
    B, NW, Cin, W = x.shape
    Cout = conv_w.shape[0]
    W2 = W // 2
    N = B * NW
    M = N * W2

    xr = jnp.transpose(x.reshape(N, Cin, W), (0, 2, 1))           # (N, W, Cin)
    xp = jnp.pad(xr, ((0, 0), (1, 1), (0, 0)))                    # conv padding=1

    # im2col (glue): conv windows for output positions 2j (even) and 2j+1 (odd)
    idx_even = (jnp.arange(W2) * 2)[:, None] + jnp.arange(3)[None, :]   # (W2, 3)
    idx_odd = idx_even + 1
    X0 = xp[:, idx_even, :].reshape(M, 3 * Cin)
    X1 = xp[:, idx_odd, :].reshape(M, 3 * Cin)

    # weight column layout matches im2col flatten order [t*Cin + ci]
    Wc = jnp.transpose(conv_w, (2, 1, 0)).reshape(3 * Cin, Cout)

    tm = min(tm_max, _round_up(M, 8))
    Mp = _round_up(M, tm)
    if Mp != M:
        X0 = jnp.pad(X0, ((0, Mp - M), (0, 0)))
        X1 = jnp.pad(X1, ((0, Mp - M), (0, 0)))

    out = pl.pallas_call(
        cnn_block_kernel,
        out_shape=jax.ShapeDtypeStruct((Mp, Cout), jnp.float32),
        grid=(Mp // tm,),
        in_specs=[
            pl.BlockSpec((tm, 3 * Cin), lambda i: (i, 0)),
            pl.BlockSpec((tm, 3 * Cin), lambda i: (i, 0)),
            pl.BlockSpec((3 * Cin, Cout), lambda i: (0, 0)),
            pl.BlockSpec((1, Cout), lambda i: (0, 0)),
            pl.BlockSpec((1, Cout), lambda i: (0, 0)),
            pl.BlockSpec((1, Cout), lambda i: (0, 0)),
        ],
        out_specs=pl.BlockSpec((tm, Cout), lambda i: (i, 0)),
        compiler_params=pltpu.CompilerParams(dimension_semantics=("parallel",)),
    )(X0, X1, Wc, conv_b.reshape(1, Cout), bn_scale.reshape(1, Cout),
      bn_shift.reshape(1, Cout))
    out = out[:M]

    # PyTorch Flatten of (N, Cout, W2) is channel-major: feature index = c*W2 + w
    out = out.reshape(N, W2, Cout).transpose(0, 2, 1).reshape(B, NW, Cout * W2)
    return out


# ----------------------------------------------------------------------------
# Fused bidirectional LSTM layer kernel.
#   * xg_ref holds the precomputed input projection for BOTH directions for this
#     timestep, gate layout: [i_f|i_b, f_f|f_b, g_f|g_b, o_f|o_b] (each slab 2H).
#     It is stored lane-contiguous as (B, T*8H); the grid index selects the
#     512-lane column window for step t (no transposes around the kernel).
#   * whh_ref is the per-gate block-diagonal recurrent weight (2H, 8H); the
#     single (B, 2H) scratch carries [h_fwd | h_bwd] (likewise c).
#   * Packed-sequence semantics: state update selected by an in-kernel
#     `t < length[b]` compare; lengths arrive once as a (B, 1) int32 block.
# ----------------------------------------------------------------------------
def bilstm_step_kernel(xg_ref, whh_ref, len_ref, o_ref, h_sc, c_sc):
    t = pl.program_id(0)

    @pl.when(t == 0)
    def _():
        h_sc[...] = jnp.zeros_like(h_sc)
        c_sc[...] = jnp.zeros_like(c_sc)

    H2 = h_sc.shape[1]                                      # 2*H  (fwd|bwd)
    gates = xg_ref[...] + jnp.dot(h_sc[...], whh_ref[...],
                                  preferred_element_type=jnp.float32)  # (B, 8H)

    i = jax.nn.sigmoid(gates[:, 0 * H2:1 * H2])
    f = jax.nn.sigmoid(gates[:, 1 * H2:2 * H2])
    g = jnp.tanh(gates[:, 2 * H2:3 * H2])
    o = jax.nn.sigmoid(gates[:, 3 * H2:4 * H2])
    c_new = f * c_sc[...] + i * g
    h_new = o * jnp.tanh(c_new)

    # packed-sequence mask: only update state while t < length[b]
    keep = t < len_ref[...]                                 # (B, 1) bool
    h_sc[...] = jnp.where(keep, h_new, h_sc[...])
    c_sc[...] = jnp.where(keep, c_new, c_sc[...])
    o_ref[...] = h_sc[...]


def reverse_by_length(x, lengths):
    # reverse each sequence within its valid length (glue for the backward pass)
    B, T, D = x.shape
    t_idx = jnp.arange(T)[None, :]
    L = lengths[:, None]
    idx = jnp.where(t_idx < L, L - 1 - t_idx, t_idx)           # (B, T)
    idx3 = jnp.broadcast_to(idx[:, :, None], (B, T, D))
    return jnp.take_along_axis(x, idx3, axis=1)


def _pack_dir_weights(p_fwd, p_bwd):
    """Pack per-direction PyTorch-style weights into the fused-kernel layout."""
    wih_f, whh_f, b_f = p_fwd
    wih_b, whh_b, b_b = p_bwd
    Din = wih_f.shape[0]
    H = whh_f.shape[0]
    # input projection: columns ordered (gate, dir, unit) -> gate slabs of 2H
    wih = jnp.stack([wih_f.reshape(Din, 4, H),
                     wih_b.reshape(Din, 4, H)], axis=2).reshape(Din, 8 * H)
    b = jnp.stack([b_f.reshape(4, H), b_b.reshape(4, H)], axis=1).reshape(8 * H)
    # recurrent weight: per-gate block-diagonal over directions, (2H, 8H)
    z = jnp.zeros((H, 4, H), whh_f.dtype)
    top = jnp.stack([whh_f.reshape(H, 4, H), z], axis=2).reshape(H, 8 * H)
    bot = jnp.stack([z, whh_b.reshape(H, 4, H)], axis=2).reshape(H, 8 * H)
    whh = jnp.concatenate([top, bot], axis=0)
    return wih, whh, b


def bilstm_layer(x_btd, lengths, p_fwd, p_bwd):
    # x_btd: (B, T, Din) batch-first -> (B, T, 2H) [fwd | bwd], PyTorch layout
    B, T, Din = x_btd.shape
    H = p_fwd[1].shape[0]
    wih, whh, b = _pack_dir_weights(p_fwd, p_bwd)

    # ---- hoisted input projection: one big matmul for all T and both dirs ----
    xg = matmul_bias(x_btd.reshape(B * T, Din), wih, b)          # (B*T, 8H)
    xg = xg.reshape(B, T, 4, 2, H)
    # backward stream consumes the length-reversed sequence; reversal commutes
    # with the per-timestep projection, so reverse the bwd half of Xg instead.
    xg_b = reverse_by_length(xg[:, :, :, 1, :].reshape(B, T, 4 * H),
                             lengths).reshape(B, T, 4, 1, H)
    # lane-contiguous layout (B, T*8H): per-step block = 512-lane column window
    xg = jnp.concatenate([xg[:, :, :, 0:1, :], xg_b],
                         axis=3).reshape(B, T * 8 * H)

    lens = lengths.reshape(B, 1).astype(jnp.int32)

    out = pl.pallas_call(
        bilstm_step_kernel,
        out_shape=jax.ShapeDtypeStruct((B, T * 2 * H), jnp.float32),
        grid=(T,),
        in_specs=[
            pl.BlockSpec((B, 8 * H), lambda t: (0, t)),
            pl.BlockSpec((2 * H, 8 * H), lambda t: (0, 0)),
            pl.BlockSpec((B, 1), lambda t: (0, 0)),
        ],
        out_specs=pl.BlockSpec((B, 2 * H), lambda t: (0, t)),
        scratch_shapes=[pltpu.VMEM((B, 2 * H), jnp.float32),
                        pltpu.VMEM((B, 2 * H), jnp.float32)],
        compiler_params=pltpu.CompilerParams(dimension_semantics=("arbitrary",)),
    )(xg, whh, lens)

    out = out.reshape(B, T, 2 * H)                               # (B, T, 2H)
    h_f = out[:, :, :H]
    h_b = reverse_by_length(out[:, :, H:], lengths)              # back to orig order
    return jnp.concatenate([h_f, h_b], axis=-1)


# ----------------------------------------------------------------------------
# Parameters & forward
# ----------------------------------------------------------------------------
def init_params(key, in_channels, cnn_out_channels, window_size, hidden, num_classes):
    ks = jax.random.split(key, 12)

    def n(k, shape, s=0.1):
        return s * jax.random.normal(k, shape, dtype=jnp.float32)

    D0 = cnn_out_channels * (window_size // 2)     # cnn_output_size (n_conv_blocks=1)
    D1 = 2 * hidden                                # bidirectional concat

    def lstm_dir(kk, Din):
        k1, k2, k3, k4 = jax.random.split(kk, 4)
        # stored pre-transposed: W_ih (Din, 4H), W_hh (H, 4H), b = b_ih + b_hh
        return (n(k1, (Din, 4 * hidden)), n(k2, (hidden, 4 * hidden)),
                n(k3, (4 * hidden,)) + n(k4, (4 * hidden,)))

    params = dict(
        conv_w=n(ks[0], (cnn_out_channels, in_channels, 3)),
        conv_b=n(ks[1], (cnn_out_channels,)),
        bn_gamma=1.0 + n(ks[2], (cnn_out_channels,)),
        bn_beta=n(ks[3], (cnn_out_channels,)),
        bn_mean=n(ks[4], (cnn_out_channels,)),
        bn_var=1.0 + 0.1 * jnp.abs(jax.random.normal(ks[5], (cnn_out_channels,),
                                                     dtype=jnp.float32)),
        fc_w=n(ks[6], (D1, num_classes)),
        fc_b=n(ks[7], (num_classes,)),
        l0_fwd=lstm_dir(ks[8], D0),
        l0_bwd=lstm_dir(ks[9], D0),
        l1_fwd=lstm_dir(ks[10], D1),
        l1_bwd=lstm_dir(ks[11], D1),
    )
    return params


def hybrid_forward(params, x, lengths):
    # BatchNorm1d in eval mode: affine with running stats.
    eps = 1e-5
    bn_scale = params['bn_gamma'] / jnp.sqrt(params['bn_var'] + eps)
    bn_shift = params['bn_beta'] - params['bn_mean'] * bn_scale

    cnn_out = cnn_block(x, params['conv_w'], params['conv_b'], bn_scale, bn_shift)
    # Dropout (cnn_dropout / lstm inter-layer dropout) is identity in eval mode.

    h1 = bilstm_layer(cnn_out, lengths, params['l0_fwd'], params['l0_bwd'])
    h2 = bilstm_layer(h1, lengths, params['l1_fwd'], params['l1_bwd'])

    B, T, D = h2.shape
    # pad_packed_sequence pads invalid timesteps with 0, then fc is applied.
    # NOTE: output time dim here is num_windows; matches PyTorch when
    # max(lengths) == num_windows (dynamic-T truncation has no static-shape equivalent).
    mask = (jnp.arange(T)[None, :, None] < lengths[:, None, None])
    h2 = jnp.where(mask, h2, 0.0)

    out = matmul_bias(h2.reshape(B * T, D), params['fc_w'], params['fc_b'])
    return out.reshape(B, T, -1)


if __name__ == "__main__":
    # Small shapes consistent with the module (hidden=64 so each fused gate slab
    # is exactly 128 lanes):
    batch, num_windows, in_channels, window_size = 2, 4, 3, 16
    cnn_out_channels, hidden, num_classes = 32, 64, 4

    key = jax.random.PRNGKey(0)
    kx, kp = jax.random.split(key)
    x = jax.random.normal(kx, (batch, num_windows, in_channels, window_size),
                          dtype=jnp.float32)
    lengths = jnp.array([num_windows, 2], dtype=jnp.int32)   # max(lengths) == num_windows

    params = init_params(kp, in_channels, cnn_out_channels, window_size,
                         hidden, num_classes)

    fwd = jax.jit(hybrid_forward)
    out = fwd(params, x, lengths)
    out = jax.block_until_ready(out)
    assert out.shape == (batch, num_windows, num_classes)
    assert bool(jnp.all(jnp.isfinite(out)))
    print("KERNEL_OK")
</pallas_src>

<mosaic_0001>
module attributes {stable_mosaic.version = 11 : i64} {
  func.func private @main(%arg0: i32) attributes {dimension_semantics = [#tpu.dimension_semantics<core_parallel>], iteration_bounds = array<i64: 2>, tpu.core_type = #tpu.core_type<sc_scalar_subcore>, window_params = []} {
    return
  }
}

module attributes {stable_mosaic.version = 11 : i64} {
  func.func private @main(%arg0: i32) attributes {dimension_semantics = [#tpu.dimension_semantics<core_parallel>], iteration_bounds = array<i64: 2>, tpu.core_type = #tpu.core_type<sc_scalar_subcore>, window_params = []} {
    return
  }
}

module attributes {stable_mosaic.version = 11 : i64} {
  func.func @cnn_block_kernel(%arg0: i32, %arg1: memref<64x9xf32, #tpu.memory_space<vmem>>, %arg2: memref<64x9xf32, #tpu.memory_space<vmem>>, %arg3: memref<9x32xf32, #tpu.memory_space<vmem>>, %arg4: memref<1x32xf32, #tpu.memory_space<vmem>>, %arg5: memref<1x32xf32, #tpu.memory_space<vmem>>, %arg6: memref<1x32xf32, #tpu.memory_space<vmem>>, %arg7: memref<64x32xf32, #tpu.memory_space<vmem>>) attributes {dimension_semantics = [#tpu.dimension_semantics<parallel>], iteration_bounds = array<i64: 1>, scalar_prefetch = 0 : i64, scratch_operands = 0 : i64, tpu.core_type = #tpu.core_type<tc>, window_params = [{transform_indices = @transform_0, window_bounds = array<i64: 64, 9>}, {transform_indices = @transform_1, window_bounds = array<i64: 64, 9>}, {pipeline_mode = #tpu.pipeline_mode<synchronous>, transform_indices = @transform_2, window_bounds = array<i64: 9, 32>}, {pipeline_mode = #tpu.pipeline_mode<synchronous>, transform_indices = @transform_3, window_bounds = array<i64: 1, 32>}, {pipeline_mode = #tpu.pipeline_mode<synchronous>, transform_indices = @transform_4, window_bounds = array<i64: 1, 32>}, {pipeline_mode = #tpu.pipeline_mode<synchronous>, transform_indices = @transform_5, window_bounds = array<i64: 1, 32>}, {transform_indices = @transform_6, window_bounds = array<i64: 64, 32>}]} {
    %c0 = arith.constant 0 : index
    %c0_0 = arith.constant 0 : index
    %0 = vector.load %arg3[%c0, %c0_0] : memref<9x32xf32, #tpu.memory_space<vmem>>, vector<9x32xf32>
    %c0_1 = arith.constant 0 : index
    %c0_2 = arith.constant 0 : index
    %1 = vector.load %arg1[%c0_1, %c0_2] : memref<64x9xf32, #tpu.memory_space<vmem>>, vector<64x9xf32>
    %cst = arith.constant dense<0.000000e+00> : vector<64x32xf32>
    %2 = tpu.matmul %1, %0, %cst {dimension_numbers = #tpu.dot_dimension_numbers<[1], [0], [0], [1], [0, 0, 1, 1], [], []>} : vector<64x9xf32>, vector<9x32xf32>, vector<64x32xf32> -> vector<64x32xf32>
    %c0_3 = arith.constant 0 : index
    %c0_4 = arith.constant 0 : index
    %3 = vector.load %arg2[%c0_3, %c0_4] : memref<64x9xf32, #tpu.memory_space<vmem>>, vector<64x9xf32>
    %cst_5 = arith.constant dense<0.000000e+00> : vector<64x32xf32>
    %4 = tpu.matmul %3, %0, %cst_5 {dimension_numbers = #tpu.dot_dimension_numbers<[1], [0], [0], [1], [0, 0, 1, 1], [], []>} : vector<64x9xf32>, vector<9x32xf32>, vector<64x32xf32> -> vector<64x32xf32>
    %c0_6 = arith.constant 0 : index
    %c0_7 = arith.constant 0 : index
    %5 = vector.load %arg4[%c0_6, %c0_7] : memref<1x32xf32, #tpu.memory_space<vmem>>, vector<1x32xf32>
    %6 = vector.broadcast %5 : vector<1x32xf32> to vector<64x32xf32>
    %7 = arith.addf %2, %6 : vector<64x32xf32>
    %c0_8 = arith.constant 0 : index
    %c0_9 = arith.constant 0 : index
    %8 = vector.load %arg5[%c0_8, %c0_9] : memref<1x32xf32, #tpu.memory_space<vmem>>, vector<1x32xf32>
    %9 = vector.broadcast %8 : vector<1x32xf32> to vector<64x32xf32>
    %10 = arith.mulf %7, %9 : vector<64x32xf32>
    %c0_10 = arith.constant 0 : index
    %c0_11 = arith.constant 0 : index
    %11 = vector.load %arg6[%c0_10, %c0_11] : memref<1x32xf32, #tpu.memory_space<vmem>>, vector<1x32xf32>
    %12 = vector.broadcast %11 : vector<1x32xf32> to vector<64x32xf32>
    %13 = arith.addf %10, %12 : vector<64x32xf32>
    %cst_12 = arith.constant 0.000000e+00 : f32
    %14 = vector.broadcast %cst_12 : f32 to vector<64x32xf32>
    %15 = arith.maximumf %13, %14 : vector<64x32xf32>
    %c0_13 = arith.constant 0 : index
    %c0_14 = arith.constant 0 : index
    %16 = vector.load %arg4[%c0_13, %c0_14] : memref<1x32xf32, #tpu.memory_space<vmem>>, vector<1x32xf32>
    %17 = vector.broadcast %16 : vector<1x32xf32> to vector<64x32xf32>
    %18 = arith.addf %4, %17 : vector<64x32xf32>
    %c0_15 = arith.constant 0 : index
    %c0_16 = arith.constant 0 : index
    %19 = vector.load %arg5[%c0_15, %c0_16] : memref<1x32xf32, #tpu.memory_space<vmem>>, vector<1x32xf32>
    %20 = vector.broadcast %19 : vector<1x32xf32> to vector<64x32xf32>
    %21 = arith.mulf %18, %20 : vector<64x32xf32>
    %c0_17 = arith.constant 0 : index
    %c0_18 = arith.constant 0 : index
    %22 = vector.load %arg6[%c0_17, %c0_18] : memref<1x32xf32, #tpu.memory_space<vmem>>, vector<1x32xf32>
    %23 = vector.broadcast %22 : vector<1x32xf32> to vector<64x32xf32>
    %24 = arith.addf %21, %23 : vector<64x32xf32>
    %cst_19 = arith.constant 0.000000e+00 : f32
    %25 = vector.broadcast %cst_19 : f32 to vector<64x32xf32>
    %26 = arith.maximumf %24, %25 : vector<64x32xf32>
    %27 = arith.maximumf %15, %26 : vector<64x32xf32>
    %c0_20 = arith.constant 0 : index
    %c0_21 = arith.constant 0 : index
    %28 = vector.load %arg7[%c0_20, %c0_21] : memref<64x32xf32, #tpu.memory_space<vmem>>, vector<64x32xf32>
    tpu.vector_store %arg7[%c0_20, %c0_21], %27 {strides = array<i32>} : memref<64x32xf32, #tpu.memory_space<vmem>>, vector<64x32xf32>,
    return
  }
  func.func @transform_0(%arg0: i32) -> (i32, i32) {
    %c0_i32 = arith.constant 0 : i32
    %c0_i32_0 = arith.constant 0 : i32
    return %arg0, %c0_i32 : i32, i32
  }
  func.func @transform_1(%arg0: i32) -> (i32, i32) {
    %c0_i32 = arith.constant 0 : i32
    %c0_i32_0 = arith.constant 0 : i32
    return %arg0, %c0_i32 : i32, i32
  }
  func.func @transform_2(%arg0: i32) -> (i32, i32) {
    %c0_i32 = arith.constant 0 : i32
    %c0_i32_0 = arith.constant 0 : i32
    %c0_i32_1 = arith.constant 0 : i32
    return %c0_i32, %c0_i32_0 : i32, i32
  }
  func.func @transform_3(%arg0: i32) -> (i32, i32) {
    %c0_i32 = arith.constant 0 : i32
    %c0_i32_0 = arith.constant 0 : i32
    %c0_i32_1 = arith.constant 0 : i32
    return %c0_i32, %c0_i32_0 : i32, i32
  }
  func.func @transform_4(%arg0: i32) -> (i32, i32) {
    %c0_i32 = arith.constant 0 : i32
    %c0_i32_0 = arith.constant 0 : i32
    %c0_i32_1 = arith.constant 0 : i32
    return %c0_i32, %c0_i32_0 : i32, i32
  }
  func.func @transform_5(%arg0: i32) -> (i32, i32) {
    %c0_i32 = arith.constant 0 : i32
    %c0_i32_0 = arith.constant 0 : i32
    %c0_i32_1 = arith.constant 0 : i32
    return %c0_i32, %c0_i32_0 : i32, i32
  }
  func.func @transform_6(%arg0: i32) -> (i32, i32) {
    %c0_i32 = arith.constant 0 : i32
    %c0_i32_0 = arith.constant 0 : i32
    return %arg0, %c0_i32 : i32, i32
  }
}

module attributes {stable_mosaic.version = 11 : i64} {
  func.func @matmul_bias_kernel(%arg0: i32, %arg1: memref<8x256xf32, #tpu.memory_space<vmem>>, %arg2: memref<256x512xf32, #tpu.memory_space<vmem>>, %arg3: memref<1x512xf32, #tpu.memory_space<vmem>>, %arg4: memref<8x512xf32, #tpu.memory_space<vmem>>) attributes {dimension_semantics = [#tpu.dimension_semantics<parallel>], iteration_bounds = array<i64: 1>, scalar_prefetch = 0 : i64, scratch_operands = 0 : i64, tpu.core_type = #tpu.core_type<tc>, window_params = [{transform_indices = @transform_0, window_bounds = array<i64: 8, 256>}, {pipeline_mode = #tpu.pipeline_mode<synchronous>, transform_indices = @transform_1, window_bounds = array<i64: 256, 512>}, {pipeline_mode = #tpu.pipeline_mode<synchronous>, transform_indices = @transform_2, window_bounds = array<i64: 1, 512>}, {transform_indices = @transform_3, window_bounds = array<i64: 8, 512>}]} {
    %c0 = arith.constant 0 : index
    %c0_0 = arith.constant 0 : index
    %0 = vector.load %arg1[%c0, %c0_0] : memref<8x256xf32, #tpu.memory_space<vmem>>, vector<8x256xf32>
    %c0_1 = arith.constant 0 : index
    %c0_2 = arith.constant 0 : index
    %1 = vector.load %arg2[%c0_1, %c0_2] : memref<256x512xf32, #tpu.memory_space<vmem>>, vector<256x512xf32>
    %cst = arith.constant dense<0.000000e+00> : vector<8x512xf32>
    %2 = tpu.matmul %0, %1, %cst {dimension_numbers = #tpu.dot_dimension_numbers<[1], [0], [0], [1], [0, 0, 1, 1], [], []>} : vector<8x256xf32>, vector<256x512xf32>, vector<8x512xf32> -> vector<8x512xf32>
    %c0_3 = arith.constant 0 : index
    %c0_4 = arith.constant 0 : index
    %3 = vector.load %arg3[%c0_3, %c0_4] : memref<1x512xf32, #tpu.memory_space<vmem>>, vector<1x512xf32>
    %4 = vector.broadcast %3 : vector<1x512xf32> to vector<8x512xf32>
    %5 = arith.addf %2, %4 : vector<8x512xf32>
    %c0_5 = arith.constant 0 : index
    %c0_6 = arith.constant 0 : index
    %6 = vector.load %arg4[%c0_5, %c0_6] : memref<8x512xf32, #tpu.memory_space<vmem>>, vector<8x512xf32>
    tpu.vector_store %arg4[%c0_5, %c0_6], %5 {strides = array<i32>} : memref<8x512xf32, #tpu.memory_space<vmem>>, vector<8x512xf32>,
    return
  }
  func.func @transform_0(%arg0: i32) -> (i32, i32) {
    %c0_i32 = arith.constant 0 : i32
    %c0_i32_0 = arith.constant 0 : i32
    return %arg0, %c0_i32 : i32, i32
  }
  func.func @transform_1(%arg0: i32) -> (i32, i32) {
    %c0_i32 = arith.constant 0 : i32
    %c0_i32_0 = arith.constant 0 : i32
    %c0_i32_1 = arith.constant 0 : i32
    return %c0_i32, %c0_i32_0 : i32, i32
  }
  func.func @transform_2(%arg0: i32) -> (i32, i32) {
    %c0_i32 = arith.constant 0 : i32
    %c0_i32_0 = arith.constant 0 : i32
    %c0_i32_1 = arith.constant 0 : i32
    return %c0_i32, %c0_i32_0 : i32, i32
  }
  func.func @transform_3(%arg0: i32) -> (i32, i32) {
    %c0_i32 = arith.constant 0 : i32
    %c0_i32_0 = arith.constant 0 : i32
    return %arg0, %c0_i32 : i32, i32
  }
}

module attributes {stable_mosaic.version = 11 : i64} {
  func.func @bilstm_step_kernel(%arg0: i32, %arg1: memref<2x512xf32, #tpu.memory_space<vmem>>, %arg2: memref<128x512xf32, #tpu.memory_space<vmem>>, %arg3: memref<2x1xi32, #tpu.memory_space<vmem>>, %arg4: memref<2x128xf32, #tpu.memory_space<vmem>>, %arg5: memref<2x128xf32, #tpu.memory_space<vmem>>, %arg6: memref<2x128xf32, #tpu.memory_space<vmem>>) attributes {dimension_semantics = [#tpu.dimension_semantics<arbitrary>], iteration_bounds = array<i64: 4>, scalar_prefetch = 0 : i64, scratch_operands = 2 : i64, tpu.core_type = #tpu.core_type<tc>, window_params = [{transform_indices = @transform_0, window_bounds = array<i64: 2, 512>}, {pipeline_mode = #tpu.pipeline_mode<synchronous>, transform_indices = @transform_1, window_bounds = array<i64: 128, 512>}, {pipeline_mode = #tpu.pipeline_mode<synchronous>, transform_indices = @transform_2, window_bounds = array<i64: 2, 1>}, {transform_indices = @transform_3, window_bounds = array<i64: 2, 128>}]} {
    %c0_i32 = arith.constant 0 : i32
    %0 = arith.cmpi eq, %arg0, %c0_i32 : i32
    %1 = arith.extui %0 : i1 to i32
    %c0_i32_0 = arith.constant 0 : i32
    %2 = arith.cmpi ne, %1, %c0_i32_0 : i32
    scf.if %2 {
      %cst_25 = arith.constant 0.000000e+00 : f32
      %49 = vector.broadcast %cst_25 : f32 to vector<2x128xf32>
      %c0_26 = arith.constant 0 : index
      %c0_27 = arith.constant 0 : index
      %50 = vector.load %arg5[%c0_26, %c0_27] : memref<2x128xf32, #tpu.memory_space<vmem>>, vector<2x128xf32>
      tpu.vector_store %arg5[%c0_26, %c0_27], %49 {strides = array<i32>} : memref<2x128xf32, #tpu.memory_space<vmem>>, vector<2x128xf32>,
      %cst_28 = arith.constant 0.000000e+00 : f32
      %51 = vector.broadcast %cst_28 : f32 to vector<2x128xf32>
      %c0_29 = arith.constant 0 : index
      %c0_30 = arith.constant 0 : index
      %52 = vector.load %arg6[%c0_29, %c0_30] : memref<2x128xf32, #tpu.memory_space<vmem>>, vector<2x128xf32>
      tpu.vector_store %arg6[%c0_29, %c0_30], %51 {strides = array<i32>} : memref<2x128xf32, #tpu.memory_space<vmem>>, vector<2x128xf32>,
    } else {
    }
    %c0 = arith.constant 0 : index
    %c0_1 = arith.constant 0 : index
    %3 = vector.load %arg1[%c0, %c0_1] : memref<2x512xf32, #tpu.memory_space<vmem>>, vector<2x512xf32>
    %c0_2 = arith.constant 0 : index
    %c0_3 = arith.constant 0 : index
    %4 = vector.load %arg5[%c0_2, %c0_3] : memref<2x128xf32, #tpu.memory_space<vmem>>, vector<2x128xf32>
    %c0_4 = arith.constant 0 : index
    %c0_5 = arith.constant 0 : index
    %5 = vector.load %arg2[%c0_4, %c0_5] : memref<128x512xf32, #tpu.memory_space<vmem>>, vector<128x512xf32>
    %cst = arith.constant dense<0.000000e+00> : vector<2x512xf32>
    %6 = tpu.matmul %4, %5, %cst {dimension_numbers = #tpu.dot_dimension_numbers<[1], [0], [0], [1], [0, 0, 1, 1], [], []>} : vector<2x128xf32>, vector<128x512xf32>, vector<2x512xf32> -> vector<2x512xf32>
    %7 = arith.addf %3, %6 : vector<2x512xf32>
    %8 = vector.extract_strided_slice %7 {offsets = [0, 0], sizes = [2, 128], strides = [1, 1]} : vector<2x512xf32> to vector<2x128xf32>
    %9 = arith.negf %8 : vector<2x128xf32>
    %10 = math.exp %9 : vector<2x128xf32>
    %cst_6 = arith.constant 1.000000e+00 : f32
    %11 = vector.broadcast %cst_6 : f32 to vector<2x128xf32>
    %12 = arith.addf %11, %10 : vector<2x128xf32>
    %13 = arith.divf %11, %12 : vector<2x128xf32>
    %14 = vector.extract_strided_slice %7 {offsets = [0, 128], sizes = [2, 128], strides = [1, 1]} : vector<2x512xf32> to vector<2x128xf32>
    %15 = arith.negf %14 : vector<2x128xf32>
    %16 = math.exp %15 : vector<2x128xf32>
    %cst_7 = arith.constant 1.000000e+00 : f32
    %17 = vector.broadcast %cst_7 : f32 to vector<2x128xf32>
    %18 = arith.addf %17, %16 : vector<2x128xf32>
    %19 = arith.divf %17, %18 : vector<2x128xf32>
    %20 = vector.extract_strided_slice %7 {offsets = [0, 256], sizes = [2, 128], strides = [1, 1]} : vector<2x512xf32> to vector<2x128xf32>
    %21 = math.tanh %20 : vector<2x128xf32>
    %22 = vector.extract_strided_slice %7 {offsets = [0, 384], sizes = [2, 128], strides = [1, 1]} : vector<2x512xf32> to vector<2x128xf32>
    %23 = arith.negf %22 : vector<2x128xf32>
    %24 = math.exp %23 : vector<2x128xf32>
    %cst_8 = arith.constant 1.000000e+00 : f32
    %25 = vector.broadcast %cst_8 : f32 to vector<2x128xf32>
    %26 = arith.addf %25, %24 : vector<2x128xf32>
    %27 = arith.divf %25, %26 : vector<2x128xf32>
    %c0_9 = arith.constant 0 : index
    %c0_10 = arith.constant 0 : index
    %28 = vector.load %arg6[%c0_9, %c0_10] : memref<2x128xf32, #tpu.memory_space<vmem>>, vector<2x128xf32>
    %29 = arith.mulf %19, %28 : vector<2x128xf32>
    %30 = arith.mulf %13, %21 : vector<2x128xf32>
    %31 = arith.addf %29, %30 : vector<2x128xf32>
    %32 = math.tanh %31 : vector<2x128xf32>
    %33 = arith.mulf %27, %32 : vector<2x128xf32>
    %c0_11 = arith.constant 0 : index
    %c0_12 = arith.constant 0 : index
    %34 = vector.load %arg3[%c0_11, %c0_12] : memref<2x1xi32, #tpu.memory_space<vmem>>, vector<2x1xi32>
    %35 = vector.broadcast %arg0 : i32 to vector<2x1xi32>
    %36 = arith.cmpi slt, %35, %34 : vector<2x1xi32>
    %c0_13 = arith.constant 0 : index
    %c0_14 = arith.constant 0 : index
    %37 = vector.load %arg5[%c0_13, %c0_14] : memref<2x128xf32, #tpu.memory_space<vmem>>, vector<2x128xf32>
    %38 = vector.shape_cast %36 : vector<2x1xi1> to vector<2x1xi1>
    %39 = vector.broadcast %38 : vector<2x1xi1> to vector<2x128xi1>
    %40 = arith.select %39, %33, %37 : vector<2x128xi1>, vector<2x128xf32>
    %c0_15 = arith.constant 0 : index
    %c0_16 = arith.constant 0 : index
    %41 = vector.load %arg5[%c0_15, %c0_16] : memref<2x128xf32, #tpu.memory_space<vmem>>, vector<2x128xf32>
    tpu.vector_store %arg5[%c0_15, %c0_16], %40 {strides = array<i32>} : memref<2x128xf32, #tpu.memory_space<vmem>>, vector<2x128xf32>,
    %c0_17 = arith.constant 0 : index
    %c0_18 = arith.constant 0 : index
    %42 = vector.load %arg6[%c0_17, %c0_18] : memref<2x128xf32, #tpu.memory_space<vmem>>, vector<2x128xf32>
    %43 = vector.shape_cast %36 : vector<2x1xi1> to vector<2x1xi1>
    %44 = vector.broadcast %43 : vector<2x1xi1> to vector<2x128xi1>
    %45 = arith.select %44, %31, %42 : vector<2x128xi1>, vector<2x128xf32>
    %c0_19 = arith.constant 0 : index
    %c0_20 = arith.constant 0 : index
    %46 = vector.load %arg6[%c0_19, %c0_20] : memref<2x128xf32, #tpu.memory_space<vmem>>, vector<2x128xf32>
    tpu.vector_store %arg6[%c0_19, %c0_20], %45 {strides = array<i32>} : memref<2x128xf32, #tpu.memory_space<vmem>>, vector<2x128xf32>,
    %c0_21 = arith.constant 0 : index
    %c0_22 = arith.constant 0 : index
    %47 = vector.load %arg5[%c0_21, %c0_22] : memref<2x128xf32, #tpu.memory_space<vmem>>, vector<2x128xf32>
    %c0_23 = arith.constant 0 : index
    %c0_24 = arith.constant 0 : index
    %48 = vector.load %arg4[%c0_23, %c0_24] : memref<2x128xf32, #tpu.memory_space<vmem>>, vector<2x128xf32>
    tpu.vector_store %arg4[%c0_23, %c0_24], %47 {strides = array<i32>} : memref<2x128xf32, #tpu.memory_space<vmem>>, vector<2x128xf32>,
    return
  }
  func.func @transform_0(%arg0: i32) -> (i32, i32) {
    %c0_i32 = arith.constant 0 : i32
    %c0_i32_0 = arith.constant 0 : i32
    return %c0_i32, %arg0 : i32, i32
  }
  func.func @transform_1(%arg0: i32) -> (i32, i32) {
    %c0_i32 = arith.constant 0 : i32
    %c0_i32_0 = arith.constant 0 : i32
    %c0_i32_1 = arith.constant 0 : i32
    return %c0_i32, %c0_i32_0 : i32, i32
  }
  func.func @transform_2(%arg0: i32) -> (i32, i32) {
    %c0_i32 = arith.constant 0 : i32
    %c0_i32_0 = arith.constant 0 : i32
    %c0_i32_1 = arith.constant 0 : i32
    return %c0_i32, %c0_i32_0 : i32, i32
  }
  func.func @transform_3(%arg0: i32) -> (i32, i32) {
    %c0_i32 = arith.constant 0 : i32
    %c0_i32_0 = arith.constant 0 : i32
    return %c0_i32, %arg0 : i32, i32
  }
}

module attributes {stable_mosaic.version = 11 : i64} {
  func.func @matmul_bias_kernel(%arg0: i32, %arg1: memref<8x128xf32, #tpu.memory_space<vmem>>, %arg2: memref<128x512xf32, #tpu.memory_space<vmem>>, %arg3: memref<1x512xf32, #tpu.memory_space<vmem>>, %arg4: memref<8x512xf32, #tpu.memory_space<vmem>>) attributes {dimension_semantics = [#tpu.dimension_semantics<parallel>], iteration_bounds = array<i64: 1>, scalar_prefetch = 0 : i64, scratch_operands = 0 : i64, tpu.core_type = #tpu.core_type<tc>, window_params = [{transform_indices = @transform_0, window_bounds = array<i64: 8, 128>}, {pipeline_mode = #tpu.pipeline_mode<synchronous>, transform_indices = @transform_1, window_bounds = array<i64: 128, 512>}, {pipeline_mode = #tpu.pipeline_mode<synchronous>, transform_indices = @transform_2, window_bounds = array<i64: 1, 512>}, {transform_indices = @transform_3, window_bounds = array<i64: 8, 512>}]} {
    %c0 = arith.constant 0 : index
    %c0_0 = arith.constant 0 : index
    %0 = vector.load %arg1[%c0, %c0_0] : memref<8x128xf32, #tpu.memory_space<vmem>>, vector<8x128xf32>
    %c0_1 = arith.constant 0 : index
    %c0_2 = arith.constant 0 : index
    %1 = vector.load %arg2[%c0_1, %c0_2] : memref<128x512xf32, #tpu.memory_space<vmem>>, vector<128x512xf32>
    %cst = arith.constant dense<0.000000e+00> : vector<8x512xf32>
    %2 = tpu.matmul %0, %1, %cst {dimension_numbers = #tpu.dot_dimension_numbers<[1], [0], [0], [1], [0, 0, 1, 1], [], []>} : vector<8x128xf32>, vector<128x512xf32>, vector<8x512xf32> -> vector<8x512xf32>
    %c0_3 = arith.constant 0 : index
    %c0_4 = arith.constant 0 : index
    %3 = vector.load %arg3[%c0_3, %c0_4] : memref<1x512xf32, #tpu.memory_space<vmem>>, vector<1x512xf32>
    %4 = vector.broadcast %3 : vector<1x512xf32> to vector<8x512xf32>
    %5 = arith.addf %2, %4 : vector<8x512xf32>
    %c0_5 = arith.constant 0 : index
    %c0_6 = arith.constant 0 : index
    %6 = vector.load %arg4[%c0_5, %c0_6] : memref<8x512xf32, #tpu.memory_space<vmem>>, vector<8x512xf32>
    tpu.vector_store %arg4[%c0_5, %c0_6], %5 {strides = array<i32>} : memref<8x512xf32, #tpu.memory_space<vmem>>, vector<8x512xf32>,
    return
  }
  func.func @transform_0(%arg0: i32) -> (i32, i32) {
    %c0_i32 = arith.constant 0 : i32
    %c0_i32_0 = arith.constant 0 : i32
    return %arg0, %c0_i32 : i32, i32
  }
  func.func @transform_1(%arg0: i32) -> (i32, i32) {
    %c0_i32 = arith.constant 0 : i32
    %c0_i32_0 = arith.constant 0 : i32
    %c0_i32_1 = arith.constant 0 : i32
    return %c0_i32, %c0_i32_0 : i32, i32
  }
  func.func @transform_2(%arg0: i32) -> (i32, i32) {
    %c0_i32 = arith.constant 0 : i32
    %c0_i32_0 = arith.constant 0 : i32
    %c0_i32_1 = arith.constant 0 : i32
    return %c0_i32, %c0_i32_0 : i32, i32
  }
  func.func @transform_3(%arg0: i32) -> (i32, i32) {
    %c0_i32 = arith.constant 0 : i32
    %c0_i32_0 = arith.constant 0 : i32
    return %arg0, %c0_i32 : i32, i32
  }
}

module attributes {stable_mosaic.version = 11 : i64} {
  func.func @matmul_bias_kernel(%arg0: i32, %arg1: memref<8x128xf32, #tpu.memory_space<vmem>>, %arg2: memref<128x128xf32, #tpu.memory_space<vmem>>, %arg3: memref<1x128xf32, #tpu.memory_space<vmem>>, %arg4: memref<8x128xf32, #tpu.memory_space<vmem>>) attributes {dimension_semantics = [#tpu.dimension_semantics<parallel>], iteration_bounds = array<i64: 1>, scalar_prefetch = 0 : i64, scratch_operands = 0 : i64, tpu.core_type = #tpu.core_type<tc>, window_params = [{transform_indices = @transform_0, window_bounds = array<i64: 8, 128>}, {pipeline_mode = #tpu.pipeline_mode<synchronous>, transform_indices = @transform_1, window_bounds = array<i64: 128, 128>}, {pipeline_mode = #tpu.pipeline_mode<synchronous>, transform_indices = @transform_2, window_bounds = array<i64: 1, 128>}, {transform_indices = @transform_3, window_bounds = array<i64: 8, 128>}]} {
    %c0 = arith.constant 0 : index
    %c0_0 = arith.constant 0 : index
    %0 = vector.load %arg1[%c0, %c0_0] : memref<8x128xf32, #tpu.memory_space<vmem>>, vector<8x128xf32>
    %c0_1 = arith.constant 0 : index
    %c0_2 = arith.constant 0 : index
    %1 = vector.load %arg2[%c0_1, %c0_2] : memref<128x128xf32, #tpu.memory_space<vmem>>, vector<128x128xf32>
    %cst = arith.constant dense<0.000000e+00> : vector<8x128xf32>
    %2 = tpu.matmul %0, %1, %cst {dimension_numbers = #tpu.dot_dimension_numbers<[1], [0], [0], [1], [0, 0, 1, 1], [], []>} : vector<8x128xf32>, vector<128x128xf32>, vector<8x128xf32> -> vector<8x128xf32>
    %c0_3 = arith.constant 0 : index
    %c0_4 = arith.constant 0 : index
    %3 = vector.load %arg3[%c0_3, %c0_4] : memref<1x128xf32, #tpu.memory_space<vmem>>, vector<1x128xf32>
    %4 = vector.broadcast %3 : vector<1x128xf32> to vector<8x128xf32>
    %5 = arith.addf %2, %4 : vector<8x128xf32>
    %c0_5 = arith.constant 0 : index
    %c0_6 = arith.constant 0 : index
    %6 = vector.load %arg4[%c0_5, %c0_6] : memref<8x128xf32, #tpu.memory_space<vmem>>, vector<8x128xf32>
    tpu.vector_store %arg4[%c0_5, %c0_6], %5 {strides = array<i32>} : memref<8x128xf32, #tpu.memory_space<vmem>>, vector<8x128xf32>,
    return
  }
  func.func @transform_0(%arg0: i32) -> (i32, i32) {
    %c0_i32 = arith.constant 0 : i32
    %c0_i32_0 = arith.constant 0 : i32
    return %arg0, %c0_i32 : i32, i32
  }
  func.func @transform_1(%arg0: i32) -> (i32, i32) {
    %c0_i32 = arith.constant 0 : i32
    %c0_i32_0 = arith.constant 0 : i32
    %c0_i32_1 = arith.constant 0 : i32
    return %c0_i32, %c0_i32_0 : i32, i32
  }
  func.func @transform_2(%arg0: i32) -> (i32, i32) {
    %c0_i32 = arith.constant 0 : i32
    %c0_i32_0 = arith.constant 0 : i32
    %c0_i32_1 = arith.constant 0 : i32
    return %c0_i32, %c0_i32_0 : i32, i32
  }
  func.func @transform_3(%arg0: i32) -> (i32, i32) {
    %c0_i32 = arith.constant 0 : i32
    %c0_i32_0 = arith.constant 0 : i32
    return %arg0, %c0_i32 : i32, i32
  }
}

</mosaic_0001>

<bundles_post_ra>
// kernel: hybrid_forward.6
= control target key start
LH: loop header
LB: loop body
LE: loop exit
PB: predicated region body
PF: predicated region fallthrough
CT: control target
= control target key end

     0   :  { %vm73_vm0 = vcmask 1040384   ;;  %vm48_vm1 = vcmask 72704   ;;  %vm480_vm2 = vmmov 1   ;;  %vm381_vm4 = vcmask 261120   ;;  %s681_s2 = inlined_call_operand.vmem [shape: f32[9,32], index: 2, kind: input, shape index: {}]   ;;  %s682_s0 = inlined_call_operand.vmem [shape: f32[64,9], index: 0, kind: input, shape index: {}]   ;;  %s683_s1 = inlined_call_operand.vmem [shape: f32[64,9], index: 1, kind: input, shape index: {}]   ;;  %s684_s3 = inlined_call_operand.vmem [shape: f32[1,32], index: 3, kind: input, shape index: {}]   ;;  %s685_s4 = inlined_call_operand.vmem [shape: f32[1,32], index: 4, kind: input, shape index: {}]   ;;  %s686_s5 = inlined_call_operand.vmem [shape: f32[1,32], index: 5, kind: input, shape index: {}]   ;;  %s687_s6 = inlined_call_operand.vmem [shape: f32[64,32], index: 6, kind: output, shape index: {}]  }
   0x1   :  { %v23_v0 = vld [vmem:[%s681_s2] sm:$0xff]  ;;  %v24_v1 = vld [vmem:[%s681_s2 + $0x8] sm:$0x1]  ;;  %vm468_vm3 = vmpackc.low %vm73_vm0, %vm480_vm2 }
   0x2   :  { %v467_v2 = vpack.c.bf16 %v24_v1, %v23_v0  ;;  %v25_v3 = vld [vmem:[%s682_s0] sm:$0xff]  ;;  %v26_v5 = vld [vmem:[%s682_s0 + $0x8] sm:$0xff]  ;;  %v27_v7 = vld [vmem:[%s682_s0 + $0x10] sm:$0xff] }
   0x3   :  { %v33_v4 = vld [vmem:[%s683_s1] sm:$0xff]  ;;  %439 = vmatprep.mubr.msk.f32.mxu0 %vm48_vm1, %v25_v3  ;;  %v34_v6 = vld [vmem:[%s683_s1 + $0x8] sm:$0xff]  ;;  %v35_v8 = vld [vmem:[%s683_s1 + $0x10] sm:$0xff] }
   0x4   :  { %455 = vmatprep.mubr.msk.f32.mxu1 %vm48_vm1, %v33_v4  ;;  %469 = vmatprep.subr.msk.bf16.mxu0 %vm468_vm3, %v467_v2  ;;  %v28_v9 = vld [vmem:[%s682_s0 + $0x18] sm:$0xff]  ;;  %v29_v11 = vld [vmem:[%s682_s0 + $0x20] sm:$0xff]  ;;  %v30_v13 = vld [vmem:[%s682_s0 + $0x28] sm:$0xff] }
   0x5   :  { %475 = vmatprep.subr.msk.bf16.mxu1 %vm468_vm3, %v467_v2  ;;  %472 = vmatpush3.bf16.msk.msra.mxu0 %vm468_vm3, %v467_v2  ;;  %v36_v10 = vld [vmem:[%s683_s1 + $0x18] sm:$0xff]  ;;  %v37_v12 = vld [vmem:[%s683_s1 + $0x20] sm:$0xff]  ;;  %v38_v14 = vld [vmem:[%s683_s1 + $0x28] sm:$0xff] }
   0x6   :  { %478 = vmatpush3.bf16.msk.msra.mxu1 %vm468_vm3, %v467_v2  ;;  %v31_v15 = vld [vmem:[%s682_s0 + $0x30] sm:$0xff]  ;;  %v32_v17 = vld [vmem:[%s682_s0 + $0x38] sm:$0xff]  ;;  %v589_v19 = vld [vmem:[%s684_s3] ss:$0 sm:$0xff] }
   0x7   :  { %v39_v16 = vld [vmem:[%s683_s1 + $0x30] sm:$0xff]  ;;  %v40_v18 = vld [vmem:[%s683_s1 + $0x38] sm:$0xff]  ;;  %v594_v21 = vld [vmem:[%s685_s4] ss:$0 sm:$0xff] }
   0x8   :  { %440 = vmatmul.mubr.msk.f32.vlgmr.msra.gmra.mrb[0].mxu0 %vm48_vm1, %v26_v5  ;;  %v601_v27 = vld [vmem:[%s686_s5] ss:$0 sm:$0xff] }
   0x9   :  { %456 = vmatmul.mubr.msk.f32.vlgmr.msra.gmra.mrb[0].mxu1 %vm48_vm1, %v34_v6  ;;  %442 = vmatprep.mubr.msk.f32.mxu0 %vm48_vm1, %v27_v7 }
   0xa   :  { %458 = vmatprep.mubr.msk.f32.mxu1 %vm48_vm1, %v35_v8 }
   0xc   :  { %443 = vmatmul.mubr.msk.f32.gmra.mrb[2].mxu0 %vm48_vm1, %v28_v9 }
   0xd   :  { %459 = vmatmul.mubr.msk.f32.gmra.mrb[2].mxu1 %vm48_vm1, %v36_v10  ;;  %445 = vmatprep.mubr.msk.f32.mxu0 %vm48_vm1, %v29_v11 }
   0xe   :  { %461 = vmatprep.mubr.msk.f32.mxu1 %vm48_vm1, %v37_v12 }
  0x10   :  { %446 = vmatmul.mubr.msk.f32.gmra.mrb[4].mxu0 %vm48_vm1, %v30_v13 }
  0x11   :  { %462 = vmatmul.mubr.msk.f32.gmra.mrb[4].mxu1 %vm48_vm1, %v38_v14  ;;  %448 = vmatprep.mubr.msk.f32.mxu0 %vm48_vm1, %v31_v15 }
  0x12   :  { %464 = vmatprep.mubr.msk.f32.mxu1 %vm48_vm1, %v39_v16 }
  0x14   :  { %449 = vmatmul.mubr.msk.f32.gmra.mrb[6].mxu0 %vm48_vm1, %v32_v17 }
  0x15   :  { %465 = vmatmul.mubr.msk.f32.gmra.mrb[6].mxu1 %vm48_vm1, %v40_v18 }
  0xdb   :  { %v441_v20 = vpop.f32.mrb[0].mxu0 }
  0xdc   :  { %v457_v22 = vpop.f32.mrb[0].mxu1  ;;  %v149_v23 = vadd.f32 %v441_v20, %v589_v19  ;;  %v143_v25 = vpop.f32.mrb[1].mxu0 }
  0xdd   :  { %v316_v24 = vadd.f32 %v457_v22, %v589_v19  ;;  %v310_v26 = vpop.f32.mrb[1].mxu1  ;;  %v144_v28 = vadd.f32 %v589_v19, %v143_v25 }
  0xde   :  { %v311_v29 = vadd.f32 %v589_v19, %v310_v26  ;;  %v190_v30 = vmul.f32 %v594_v21, %v149_v23 }
  0xdf   :  { %v350_v31 = vmul.f32 %v594_v21, %v316_v24  ;;  %v189_v32 = vmul.f32 %v594_v21, %v144_v28  ;;  %v444_v34 = vpop.f32.mrb[2].mxu0 }
  0xe0   :  { %v349_v33 = vmul.f32 %v594_v21, %v311_v29  ;;  %v460_v35 = vpop.f32.mrb[2].mxu1  ;;  %v205_v36 = vadd.f32 %v601_v27, %v190_v30  ;;  %v159_v38 = vadd.f32 %v444_v34, %v589_v19  ;;  %v153_v40 = vpop.f32.mrb[3].mxu0 }
  0xe1   :  { %v358_v37 = vadd.f32 %v601_v27, %v350_v31  ;;  %v326_v39 = vadd.f32 %v460_v35, %v589_v19  ;;  %v320_v41 = vpop.f32.mrb[3].mxu1  ;;  %v204_v42 = vadd.f32 %v601_v27, %v189_v32  ;;  %v154_v44 = vadd.f32 %v589_v19, %v153_v40 }
  0xe2   :  { %v357_v43 = vadd.f32 %v601_v27, %v349_v33  ;;  %v321_v45 = vadd.f32 %v589_v19, %v320_v41  ;;  %v213_v46 = vmax.f32 %v205_v36, 0.0  ;;  %v192_v48 = vmul.f32 %v594_v21, %v159_v38 }
  0xe3   :  { %v366_v47 = vmax.f32 %v358_v37, 0.0  ;;  %v352_v49 = vmul.f32 %v594_v21, %v326_v39  ;;  %v212_v50 = vmax.f32 %v204_v42, 0.0  ;;  %v191_v52 = vmul.f32 %v594_v21, %v154_v44  ;;  %v447_v54 = vpop.f32.mrb[4].mxu0 }
  0xe4   :  { %v365_v51 = vmax.f32 %v357_v43, 0.0  ;;  %v351_v53 = vmul.f32 %v594_v21, %v321_v45  ;;  %v463_v55 = vpop.f32.mrb[4].mxu1  ;;  %v207_v57 = vadd.f32 %v601_v27, %v192_v48  ;;  %v169_v59 = vadd.f32 %v447_v54, %v589_v19  ;;  %v163_v60 = vpop.f32.mrb[5].mxu0 }
  0xe5   :  { %v374_v56 = vmax.f32 %v213_v46, %v366_v47  ;;  %v360_v58 = vadd.f32 %v601_v27, %v352_v49  ;;  %v330_v61 = vpop.f32.mrb[5].mxu1  ;;  %v206_v63 = vadd.f32 %v601_v27, %v191_v52  ;;  %v336_v1 = vadd.f32 %v463_v55, %v589_v19 }
  0xe6   :  { %v373_v62 = vmax.f32 %v212_v50, %v365_v51  ;;  %v359_v0 = vadd.f32 %v601_v27, %v351_v53  ;;  %v215_v2 = vmax.f32 %v207_v57, 0.0  ;;  %v194_v4 = vmul.f32 %v594_v21, %v169_v59 }
  0xe7   :  { %383 = vst.msk [vmem:[%s687_s6 + $0x8] sm:$0xff] %vm381_vm4, %v374_v56  ;;  %v368_v3 = vmax.f32 %v360_v58, 0.0  ;;  %v164_v5 = vadd.f32 %v589_v19, %v163_v60  ;;  %v214_v6 = vmax.f32 %v206_v63, 0.0  ;;  %v354_v8 = vmul.f32 %v594_v21, %v336_v1  ;;  %v450_v10 = vpop.f32.mrb[6].mxu0 }
  0xe8   :  { %382 = vst.msk [vmem:[%s687_s6] sm:$0xff] %vm381_vm4, %v373_v62  ;;  %v367_v7 = vmax.f32 %v359_v0, 0.0  ;;  %v331_v9 = vadd.f32 %v589_v19, %v330_v61  ;;  %v466_v11 = vpop.f32.mrb[6].mxu1  ;;  %v209_v13 = vadd.f32 %v601_v27, %v194_v4  ;;  %v179_v15 = vadd.f32 %v450_v10, %v589_v19  ;;  %v173_v16 = vpop.f32.mrb[7].mxu0 }
  0xe9   :  { %v376_v12 = vmax.f32 %v215_v2, %v368_v3  ;;  %v193_v14 = vmul.f32 %v594_v21, %v164_v5  ;;  %v340_v17 = vpop.f32.mrb[7].mxu1  ;;  %v362_v20 = vadd.f32 %v601_v27, %v354_v8  ;;  %v346_v23 = vadd.f32 %v466_v11, %v589_v19 }
  0xea   :  { %v375_v18 = vmax.f32 %v214_v6, %v367_v7  ;;  %v353_v22 = vmul.f32 %v594_v21, %v331_v9  ;;  %v217_v24 = vmax.f32 %v209_v13, 0.0  ;;  %v196_v26 = vmul.f32 %v594_v21, %v179_v15 }
  0xeb   :  { %385 = vst.msk [vmem:[%s687_s6 + $0x18] sm:$0xff] %vm381_vm4, %v376_v12  ;;  %v208_v25 = vadd.f32 %v601_v27, %v193_v14  ;;  %v174_v28 = vadd.f32 %v589_v19, %v173_v16  ;;  %v370_v29 = vmax.f32 %v362_v20, 0.0  ;;  %v356_v31 = vmul.f32 %v594_v21, %v346_v23 }
  0xec   :  { %384 = vst.msk [vmem:[%s687_s6 + $0x10] sm:$0xff] %vm381_vm4, %v375_v18  ;;  %v361_v30 = vadd.f32 %v601_v27, %v353_v22  ;;  %v341_v32 = vadd.f32 %v589_v19, %v340_v17  ;;  %v211_v34 = vadd.f32 %v601_v27, %v196_v26 }
  0xed   :  { %v216_v33 = vmax.f32 %v208_v25, 0.0  ;;  %v195_v35 = vmul.f32 %v594_v21, %v174_v28  ;;  %v378_v36 = vmax.f32 %v217_v24, %v370_v29  ;;  %v364_v38 = vadd.f32 %v601_v27, %v356_v31 }
  0xee   :  { %v369_v37 = vmax.f32 %v361_v30, 0.0  ;;  %v355_v39 = vmul.f32 %v594_v21, %v341_v32  ;;  %v219_v40 = vmax.f32 %v211_v34, 0.0 }
  0xef   :  { %v210_v41 = vadd.f32 %v601_v27, %v195_v35  ;;  %387 = vst.msk [vmem:[%s687_s6 + $0x28] sm:$0xff] %vm381_vm4, %v378_v36  ;;  %v372_v42 = vmax.f32 %v364_v38, 0.0 }
  0xf0   :  { %v377_v19 = vmax.f32 %v216_v33, %v369_v37  ;;  %v363_v43 = vadd.f32 %v601_v27, %v355_v39 }
  0xf1   :  { %v218_v44 = vmax.f32 %v210_v41, 0.0  ;;  %v380_v45 = vmax.f32 %v219_v40, %v372_v42 }
  0xf2   :  { %386 = vst.msk [vmem:[%s687_s6 + $0x20] sm:$0xff] %vm381_vm4, %v377_v19  ;;  %v371_v21 = vmax.f32 %v363_v43, 0.0 }
  0xf3   :  { %389 = vst.msk [vmem:[%s687_s6 + $0x38] sm:$0xff] %vm381_vm4, %v380_v45 }
  0xf4   :  { %v379_v46 = vmax.f32 %v218_v44, %v371_v21 }
  0xf6   :  { %388 = vst.msk [vmem:[%s687_s6 + $0x30] sm:$0xff] %vm381_vm4, %v379_v46 }

// kernel: squeeze.2
= control target key start
LH: loop header
LB: loop body
LE: loop exit
PB: predicated region body
PF: predicated region fallthrough
CT: control target
= control target key end

     0   :  { %s244_s0 = inlined_call_operand.vmem [shape: f32[2,4,4,64], index: 0, kind: input, shape index: {}]   ;;  %s245_s1 = inlined_call_operand.hbm [shape: f32[2,4,256], index: 1, kind: output, shape index: {}]  }
   0x1   :  { %v157_v0 = vld [vmem:[%s244_s0 + $0xc] sm:$0xf]  ;;  %v158_v1 = vld [vmem:[%s244_s0 + $0x8] sm:$0xf]  ;;  %v159_v2 = vld [vmem:[%s244_s0 + $0x4] sm:$0xf] }
   0x2   :  { %29 = vst [vmem:[#allocation3 + $0x18] sm:$0xf] %v157_v0  ;;  %34 = vst [vmem:[#allocation3 + $0x10] sm:$0xf] %v158_v1  ;;  %v39_v3 = vld [vmem:[%s244_s0] sm:$0xf] }
   0x3   :  { %38 = vst [vmem:[#allocation3 + $0x8] sm:$0xf] %v159_v2  ;;  %40 = vst [vmem:[#allocation3] sm:$0xf] %v39_v3  ;;  %v153_v4 = vld [vmem:[%s244_s0 + $0x1c] sm:$0xf] }
   0x4   :  { %v154_v5 = vld [vmem:[%s244_s0 + $0x18] sm:$0xf]  ;;  %v155_v6 = vld [vmem:[%s244_s0 + $0x14] sm:$0xf]  ;;  %9 = vst [vmem:[#allocation3 + $0x38] sm:$0xf] %v153_v4 }
   0x5   :  { %14 = vst [vmem:[#allocation3 + $0x30] sm:$0xf] %v154_v5  ;;  %19 = vst [vmem:[#allocation3 + $0x28] sm:$0xf] %v155_v6  ;;  %v156_v7 = vld [vmem:[%s244_s0 + $0x10] sm:$0xf] }
   0x6   :  { %24 = vst [vmem:[#allocation3 + $0x20] sm:$0xf] %v156_v7 }
   0x7   :  { %2 = vsyncpa [#allocation1], 0  ;;  %s46_s0 = smov 3  ;;  %s52_s22 = smov 3  ;;  %vm43_vm0 = vcmask 523264   ;;  %vm91_vm1 = vcmask 1047556  }
   0x8   :  { %s41_s23 = smov 3  ;;  %s70_s24 = smov 3  ;;  %vm95_vm2 = vcmask 1048064  }
   0x9   :  { %s58_s25 = smov 3  ;;  %v53_v9 = vld [vmem:[#allocation3 + $0x10] ss:$2 sm:%s52_s22]   ;;  %s64_s26 = smov 3 }
   0xa   :  { %v47_v8 = vld [vmem:[#allocation3 + $0x8] ss:$2 sm:%s46_s0]   ;;  %v88_v11 = vld [vmem:[#allocation3 + $0x1] ss:$8 sm:$0xf]   ;;  %s76_s27 = smov 3 }
   0xb   :  { %v42_v10 = vld [vmem:[#allocation3] ss:$2 sm:%s41_s23]   ;;  %50 = vst.msk [vmem:[#allocation2 + $0x1] ss:$8 sm:$0x3] %vm43_vm0, %v47_v8   ;;  %s82_s28 = smov 3 }
   0xc   :  { %56 = vst.msk [vmem:[#allocation2 + $0x2] ss:$8 sm:$0x3] %vm43_vm0, %v53_v9   ;;  %v90_v12 = vld [vmem:[#allocation3 - $0x1d] ss:$8 sm:$0xf0]  }
   0xd   :  { %44 = vst.msk [vmem:[#allocation2] ss:$8 sm:$0x3] %vm43_vm0, %v42_v10   ;;  %v71_v13 = vld [vmem:[#allocation3 + $0x28] ss:$2 sm:%s70_s24]   ;;  %v92_v14 = vsel %vm91_vm1, %v90_v12, %v88_v11  ;;  %s186_s29 = smov 64  }
   0xe   :  { %v100_v15 = vld [vmem:[#allocation3 + $0x21] ss:$8 sm:$0xf]   ;;  %v102_v16 = vld [vmem:[#allocation3 + $0x3] ss:$8 sm:$0xf0]   ;;  %93 = vrot.lane.b32.xlu0 %v92_v14, %s186_s29 }
   0xf   :  { %74 = vst.msk [vmem:[#allocation2 + $0x11] ss:$8 sm:$0x3] %vm43_vm0, %v71_v13   ;;  %v59_v17 = vld [vmem:[#allocation3 + $0x18] ss:$2 sm:%s58_s25]   ;;  %v104_v20 = vsel %vm91_vm1, %v102_v16, %v100_v15  ;;  %s187_s30 = smov [#allocation0]  }
  0x10   :  { %v65_v18 = vld [vmem:[#allocation3 + $0x20] ss:$2 sm:%s64_s26]   ;;  %v77_v19 = vld [vmem:[#allocation3 + $0x30] ss:$2 sm:%s76_s27]   ;;  %s139_s2 = sshll.u32 %s187_s30, 4  ;;  %s140_s2 = int_to_ptr.vmem [resolvable:$true] %s139_s2 }
  0x11   :  { %62 = vst.msk [vmem:[#allocation2 + $0x3] ss:$8 sm:$0x3] %vm43_vm0, %v59_v17   ;;  %68 = vst.msk [vmem:[#allocation2 + $0x10] ss:$8 sm:$0x3] %vm43_vm0, %v65_v18   ;;  %p167_p1 = scmp.lt.s32.totalorder %s140_s2, %s140_s2 }
  0x12   :  { %80 = vst.msk [vmem:[#allocation2 + $0x12] ss:$8 sm:$0x3] %vm43_vm0, %v77_v19   ;;  %v83_v21 = vld [vmem:[#allocation3 + $0x38] ss:$2 sm:%s82_s28]   ;;  %105 = vrot.lane.b32.xlu0 %v104_v20, %s186_s29  ;;  %s162_s3 = scalar_lea.vmem %s140_s2, 256 }
  0x13   :  { %86 = vst.msk [vmem:[#allocation2 + $0x13] ss:$8 sm:$0x3] %vm43_vm0, %v83_v21   ;;  %p163_p0 = scmp.ne.s32.totalorder %s140_s2, %s162_s3  ;;  %p168_p2 = scmp.lt.s32.totalorder %s162_s3, %s162_s3 }
  0x15   :  { %p169_p3 = por %p168_p2, %p167_p1 }
  0x17   :  { %p170_p4 = pnand %p169_p3, %p163_p0 }
  0x80   :  { %v94_v22 = vpop.permute.xlu0 %93  }
  0x81   :  { %96 = vst.msk [vmem:[#allocation2] sm:$0xf] %vm95_vm2, %v94_v22   ;;  %98 = vst.msk [vmem:[#allocation2 + $0x4] sm:$0xf0] %vm95_vm2, %v94_v22  }
  0x84   :  { %v106_v23 = vpop.permute.xlu0 %105  }
  0x85   :  { %109 = vst.msk [vmem:[#allocation2 + $0x10] sm:$0xf] %vm95_vm2, %v106_v23   ;;  %111 = vst.msk [vmem:[#allocation2 + $0x14] sm:$0xf0] %vm95_vm2, %v106_v23  }
  0x88   :  { %v115_v24 = vld [vmem:[#allocation2] sm:$0xf]  ;;  %v119_v25 = vld [vmem:[#allocation2 + $0x8] sm:$0xf] }
  0x89   :  { %117 = vst [vmem:[#allocation0] sm:$0xf] %v115_v24  ;;  %122 = vst [vmem:[#allocation0 + $0x4] sm:$0xf] %v119_v25 }
  0x8c   :  { %v124_v26 = vld [vmem:[#allocation2 + $0x10] sm:$0xf]  ;;  %v130_v27 = vld [vmem:[#allocation2 + $0x18] sm:$0xf] }
  0x8d   :  { %128 = vst [vmem:[#allocation0 + $0x8] sm:$0xf] %v124_v26  ;;  %134 = vst [vmem:[#allocation0 + $0xc] sm:$0xf] %v130_v27 }
  0x8e   :  { %173 = shalt.err (!%p170_p4)
}
  0x8f   :  { %s174_s6 = scalar_lea.hbm %s245_s1, 256 }
  0x90   :  { %p175_p5 = scmp.ne.s32.totalorder %s245_s1, %s174_s6  ;;  %p178_p6 = scmp.lt.u32.totalorder %s174_s6, %s245_s1 }
  0x92   :  { %p180_p7 = pnand %p178_p6, %p175_p5 }
  0x94   :  { %183 = shalt.err (!%p180_p7)
}
  0x95   :  { %142 = dma.vmem_to_hbm [thread:$0]  %s140_s2, 256, %s245_s1, [#allocation1]  }
  0x96   :  { %184 = dma.done.wait [#allocation1], 256  }
  0x97   :  { %185 = vsyncadd [#allocation1], 4294967040 }
  0x98   :  { %144 = vsyncpa [#allocation1], 1 }

// kernel: hybrid_forward.7
= control target key start
LH: loop header
LB: loop body
LE: loop exit
PB: predicated region body
PF: predicated region fallthrough
CT: control target
= control target key end

     0   :  { %s869_s1 = inlined_call_operand.vmem [shape: f32[256,512], index: 1, kind: input, shape index: {}]   ;;  %s870_s0 = inlined_call_operand.vmem [shape: f32[8,256], index: 0, kind: input, shape index: {}]   ;;  %s871_s2 = inlined_call_operand.vmem [shape: f32[1,512], index: 2, kind: input, shape index: {}]   ;;  %s872_s3 = inlined_call_operand.vmem [shape: f32[8,512], index: 3, kind: output, shape index: {}]  }
   0x1   :  { %v17_v0 = vld [vmem:[%s869_s1 + $0x8] sm:$0xff]  ;;  %v19_v2 = vld [vmem:[%s869_s1 + $0x18] sm:$0xff]  ;;  %v16_v5 = vld [vmem:[%s869_s1] sm:$0xff] }
   0x2   :  { %v21_v1 = vld [vmem:[%s869_s1 + $0x28] sm:$0xff]  ;;  %v23_v4 = vld [vmem:[%s869_s1 + $0x38] sm:$0xff]  ;;  %v20_v6 = vld [vmem:[%s869_s1 + $0x20] sm:$0xff] }
   0x3   :  { %v316_v3 = vpack.c.bf16 %v21_v1, %v17_v0  ;;  %v380_v7 = vpack.c.bf16 %v23_v4, %v19_v2  ;;  %v318_v8 = vpack.c.bf16 %v20_v6, %v16_v5  ;;  %v18_v9 = vld [vmem:[%s869_s1 + $0x10] sm:$0xff]  ;;  %v25_v11 = vld [vmem:[%s869_s1 + $0x48] sm:$0xff]  ;;  %v27_v14 = vld [vmem:[%s869_s1 + $0x58] sm:$0xff] }
   0x4   :  { %v22_v10 = vld [vmem:[%s869_s1 + $0x30] sm:$0xff]  ;;  %v29_v13 = vld [vmem:[%s869_s1 + $0x68] sm:$0xff]  ;;  %v31_v15 = vld [vmem:[%s869_s1 + $0x78] sm:$0xff] }
   0x5   :  { %317 = vmatprep.subr.bf16.mxu0 %v316_v3  ;;  %v382_v12 = vpack.c.bf16 %v22_v10, %v18_v9  ;;  %381 = vmatprep.subr.bf16.mxu1 %v380_v7  ;;  %v320_v16 = vpack.c.bf16 %v29_v13, %v25_v11  ;;  %v384_v17 = vpack.c.bf16 %v31_v15, %v27_v14  ;;  %v24_v18 = vld [vmem:[%s869_s1 + $0x40] sm:$0xff]  ;;  %v26_v20 = vld [vmem:[%s869_s1 + $0x50] sm:$0xff]  ;;  %v33_v23 = vld [vmem:[%s869_s1 + $0x88] sm:$0xff] }
   0x6   :  { %319 = vmatpush1.bf16.msra.mxu0 %v318_v8  ;;  %v28_v19 = vld [vmem:[%s869_s1 + $0x60] sm:$0xff]  ;;  %v30_v22 = vld [vmem:[%s869_s1 + $0x70] sm:$0xff]  ;;  %v37_v24 = vld [vmem:[%s869_s1 + $0xa8] sm:$0xff] }
   0x7   :  { %383 = vmatpush1.bf16.msra.mxu1 %v382_v12  ;;  %v322_v21 = vpack.c.bf16 %v28_v19, %v24_v18  ;;  %321 = vmatprep.subr.bf16.mxu0 %v320_v16  ;;  %v386_v25 = vpack.c.bf16 %v30_v22, %v26_v20  ;;  %v324_v26 = vpack.c.bf16 %v37_v24, %v33_v23  ;;  %v35_v27 = vld [vmem:[%s869_s1 + $0x98] sm:$0xff]  ;;  %v32_v29 = vld [vmem:[%s869_s1 + $0x80] sm:$0xff]  ;;  %v34_v32 = vld [vmem:[%s869_s1 + $0x90] sm:$0xff] }
   0x8   :  { %385 = vmatprep.subr.bf16.mxu1 %v384_v17  ;;  %v39_v28 = vld [vmem:[%s869_s1 + $0xb8] sm:$0xff]  ;;  %v36_v31 = vld [vmem:[%s869_s1 + $0xa0] sm:$0xff]  ;;  %v38_v33 = vld [vmem:[%s869_s1 + $0xb0] sm:$0xff] }
   0x9   :  { %v388_v30 = vpack.c.bf16 %v39_v28, %v35_v27  ;;  %v326_v34 = vpack.c.bf16 %v36_v31, %v32_v29  ;;  %v41_v35 = vld [vmem:[%s869_s1 + $0xc8] sm:$0xff]  ;;  %v43_v37 = vld [vmem:[%s869_s1 + $0xd8] sm:$0xff]  ;;  %v390_v38 = vpack.c.bf16 %v38_v33, %v34_v32  ;;  %v40_v41 = vld [vmem:[%s869_s1 + $0xc0] sm:$0xff] }
   0xa   :  { %323 = vmatpush1.bf16.msra.mxu0 %v322_v21  ;;  %v45_v36 = vld [vmem:[%s869_s1 + $0xe8] sm:$0xff]  ;;  %v47_v40 = vld [vmem:[%s869_s1 + $0xf8] sm:$0xff]  ;;  %v44_v42 = vld [vmem:[%s869_s1 + $0xe0] sm:$0xff] }
   0xb   :  { %387 = vmatpush1.bf16.msra.mxu1 %v386_v25  ;;  %325 = vmatprep.subr.bf16.mxu0 %v324_v26  ;;  %v328_v39 = vpack.c.bf16 %v45_v36, %v41_v35  ;;  %v392_v43 = vpack.c.bf16 %v47_v40, %v43_v37  ;;  %v42_v44 = vld [vmem:[%s869_s1 + $0xd0] sm:$0xff]  ;;  %v49_v46 = vld [vmem:[%s869_s1 + $0x108] sm:$0xff]  ;;  %v51_v48 = vld [vmem:[%s869_s1 + $0x118] sm:$0xff]  ;;  %v330_v50 = vpack.c.bf16 %v44_v42, %v40_v41 }
   0xc   :  { %389 = vmatprep.subr.bf16.mxu1 %v388_v30  ;;  %v46_v45 = vld [vmem:[%s869_s1 + $0xf0] sm:$0xff]  ;;  %v53_v47 = vld [vmem:[%s869_s1 + $0x128] sm:$0xff]  ;;  %v55_v49 = vld [vmem:[%s869_s1 + $0x138] sm:$0xff] }
   0xd   :  { %v394_v51 = vpack.c.bf16 %v46_v45, %v42_v44  ;;  %v332_v52 = vpack.c.bf16 %v53_v47, %v49_v46  ;;  %v48_v53 = vld [vmem:[%s869_s1 + $0x100] sm:$0xff]  ;;  %v50_v55 = vld [vmem:[%s869_s1 + $0x110] sm:$0xff]  ;;  %v396_v56 = vpack.c.bf16 %v55_v49, %v51_v48  ;;  %v57_v58 = vld [vmem:[%s869_s1 + $0x148] sm:$0xff] }
   0xe   :  { %327 = vmatpush1.bf16.msra.mxu0 %v326_v34  ;;  %v52_v54 = vld [vmem:[%s869_s1 + $0x120] sm:$0xff]  ;;  %v54_v57 = vld [vmem:[%s869_s1 + $0x130] sm:$0xff]  ;;  %v61_v59 = vld [vmem:[%s869_s1 + $0x168] sm:$0xff] }
   0xf   :  { %391 = vmatpush1.bf16.msra.mxu1 %v390_v38  ;;  %329 = vmatprep.subr.bf16.mxu0 %v328_v39  ;;  %v59_v60 = vld [vmem:[%s869_s1 + $0x158] sm:$0xff]  ;;  %v334_v62 = vpack.c.bf16 %v52_v54, %v48_v53  ;;  %v398_v63 = vpack.c.bf16 %v54_v57, %v50_v55  ;;  %v336_v0 = vpack.c.bf16 %v61_v59, %v57_v58  ;;  %v56_v1 = vld [vmem:[%s869_s1 + $0x140] sm:$0xff]  ;;  %v58_v3 = vld [vmem:[%s869_s1 + $0x150] sm:$0xff] }
  0x10   :  { %393 = vmatprep.subr.bf16.mxu1 %v392_v43  ;;  %v63_v61 = vld [vmem:[%s869_s1 + $0x178] sm:$0xff]  ;;  %v60_v2 = vld [vmem:[%s869_s1 + $0x160] sm:$0xff]  ;;  %v62_v5 = vld [vmem:[%s869_s1 + $0x170] sm:$0xff] }
  0x11   :  { %v400_v4 = vpack.c.bf16 %v63_v61, %v59_v60  ;;  %v65_v6 = vld [vmem:[%s869_s1 + $0x188] sm:$0xff]  ;;  %v67_v8 = vld [vmem:[%s869_s1 + $0x198] sm:$0xff]  ;;  %v338_v10 = vpack.c.bf16 %v60_v2, %v56_v1  ;;  %v402_v11 = vpack.c.bf16 %v62_v5, %v58_v3  ;;  %v64_v13 = vld [vmem:[%s869_s1 + $0x180] sm:$0xff] }
  0x12   :  { %331 = vmatpush1.bf16.msra.mxu0 %v330_v50  ;;  %v69_v7 = vld [vmem:[%s869_s1 + $0x1a8] sm:$0xff]  ;;  %v71_v9 = vld [vmem:[%s869_s1 + $0x1b8] sm:$0xff]  ;;  %v68_v14 = vld [vmem:[%s869_s1 + $0x1a0] sm:$0xff] }
  0x13   :  { %395 = vmatpush1.bf16.msra.mxu1 %v394_v51  ;;  %333 = vmatprep.subr.bf16.mxu0 %v332_v52  ;;  %v340_v12 = vpack.c.bf16 %v69_v7, %v65_v6  ;;  %v66_v15 = vld [vmem:[%s869_s1 + $0x190] sm:$0xff]  ;;  %v404_v16 = vpack.c.bf16 %v71_v9, %v67_v8  ;;  %v73_v18 = vld [vmem:[%s869_s1 + $0x1c8] sm:$0xff]  ;;  %v75_v20 = vld [vmem:[%s869_s1 + $0x1d8] sm:$0xff]  ;;  %v342_v22 = vpack.c.bf16 %v68_v14, %v64_v13 }
  0x14   :  { %397 = vmatprep.subr.bf16.mxu1 %v396_v56  ;;  %v70_v17 = vld [vmem:[%s869_s1 + $0x1b0] sm:$0xff]  ;;  %v77_v19 = vld [vmem:[%s869_s1 + $0x1e8] sm:$0xff]  ;;  %v79_v21 = vld [vmem:[%s869_s1 + $0x1f8] sm:$0xff] }
  0x15   :  { %v406_v23 = vpack.c.bf16 %v70_v17, %v66_v15  ;;  %v344_v24 = vpack.c.bf16 %v77_v19, %v73_v18  ;;  %v72_v25 = vld [vmem:[%s869_s1 + $0x1c0] sm:$0xff]  ;;  %v74_v27 = vld [vmem:[%s869_s1 + $0x1d0] sm:$0xff]  ;;  %v408_v28 = vpack.c.bf16 %v79_v21, %v75_v20  ;;  %v81_v30 = vld [vmem:[%s869_s1 + $0x208] sm:$0xff] }
  0x16   :  { %335 = vmatpush1.bf16.msra.mxu0 %v334_v62  ;;  %v76_v26 = vld [vmem:[%s869_s1 + $0x1e0] sm:$0xff]  ;;  %v78_v29 = vld [vmem:[%s869_s1 + $0x1f0] sm:$0xff]  ;;  %v85_v31 = vld [vmem:[%s869_s1 + $0x228] sm:$0xff] }
  0x17   :  { %399 = vmatpush1.bf16.msra.mxu1 %v398_v63  ;;  %337 = vmatprep.subr.bf16.mxu0 %v336_v0  ;;  %v83_v32 = vld [vmem:[%s869_s1 + $0x218] sm:$0xff]  ;;  %v346_v34 = vpack.c.bf16 %v76_v26, %v72_v25  ;;  %v410_v35 = vpack.c.bf16 %v78_v29, %v74_v27  ;;  %v348_v36 = vpack.c.bf16 %v85_v31, %v81_v30  ;;  %v80_v37 = vld [vmem:[%s869_s1 + $0x200] sm:$0xff]  ;;  %v82_v39 = vld [vmem:[%s869_s1 + $0x210] sm:$0xff] }
  0x18   :  { %401 = vmatprep.subr.bf16.mxu1 %v400_v4  ;;  %v87_v33 = vld [vmem:[%s869_s1 + $0x238] sm:$0xff]  ;;  %v84_v38 = vld [vmem:[%s869_s1 + $0x220] sm:$0xff]  ;;  %v86_v41 = vld [vmem:[%s869_s1 + $0x230] sm:$0xff] }
  0x19   :  { %v412_v40 = vpack.c.bf16 %v87_v33, %v83_v32  ;;  %v89_v42 = vld [vmem:[%s869_s1 + $0x248] sm:$0xff]  ;;  %v91_v44 = vld [vmem:[%s869_s1 + $0x258] sm:$0xff]  ;;  %v350_v46 = vpack.c.bf16 %v84_v38, %v80_v37  ;;  %v414_v47 = vpack.c.bf16 %v86_v41, %v82_v39  ;;  %v88_v49 = vld [vmem:[%s869_s1 + $0x240] sm:$0xff] }
  0x1a   :  { %339 = vmatpush1.bf16.msra.mxu0 %v338_v10  ;;  %v93_v43 = vld [vmem:[%s869_s1 + $0x268] sm:$0xff]  ;;  %v95_v45 = vld [vmem:[%s869_s1 + $0x278] sm:$0xff]  ;;  %v92_v50 = vld [vmem:[%s869_s1 + $0x260] sm:$0xff] }
  0x1b   :  { %403 = vmatpush1.bf16.msra.mxu1 %v402_v11  ;;  %341 = vmatprep.subr.bf16.mxu0 %v340_v12  ;;  %v352_v48 = vpack.c.bf16 %v93_v43, %v89_v42  ;;  %v90_v51 = vld [vmem:[%s869_s1 + $0x250] sm:$0xff]  ;;  %v416_v52 = vpack.c.bf16 %v95_v45, %v91_v44  ;;  %v97_v54 = vld [vmem:[%s869_s1 + $0x288] sm:$0xff]  ;;  %v99_v56 = vld [vmem:[%s869_s1 + $0x298] sm:$0xff]  ;;  %v354_v58 = vpack.c.bf16 %v92_v50, %v88_v49 }
  0x1c   :  { %405 = vmatprep.subr.bf16.mxu1 %v404_v16  ;;  %v94_v53 = vld [vmem:[%s869_s1 + $0x270] sm:$0xff]  ;;  %v101_v55 = vld [vmem:[%s869_s1 + $0x2a8] sm:$0xff]  ;;  %v103_v57 = vld [vmem:[%s869_s1 + $0x2b8] sm:$0xff] }
  0x1d   :  { %v418_v59 = vpack.c.bf16 %v94_v53, %v90_v51  ;;  %v356_v60 = vpack.c.bf16 %v101_v55, %v97_v54  ;;  %v96_v61 = vld [vmem:[%s869_s1 + $0x280] sm:$0xff]  ;;  %v98_v63 = vld [vmem:[%s869_s1 + $0x290] sm:$0xff]  ;;  %v420_v0 = vpack.c.bf16 %v103_v57, %v99_v56  ;;  %v105_v2 = vld [vmem:[%s869_s1 + $0x2c8] sm:$0xff] }
  0x1e   :  { %343 = vmatpush1.bf16.msra.mxu0 %v342_v22  ;;  %v100_v62 = vld [vmem:[%s869_s1 + $0x2a0] sm:$0xff]  ;;  %v102_v1 = vld [vmem:[%s869_s1 + $0x2b0] sm:$0xff]  ;;  %v109_v3 = vld [vmem:[%s869_s1 + $0x2e8] sm:$0xff] }
  0x1f   :  { %407 = vmatpush1.bf16.msra.mxu1 %v406_v23  ;;  %345 = vmatprep.subr.bf16.mxu0 %v344_v24  ;;  %v107_v4 = vld [vmem:[%s869_s1 + $0x2d8] sm:$0xff]  ;;  %v358_v6 = vpack.c.bf16 %v100_v62, %v96_v61  ;;  %v104_v7 = vld [vmem:[%s869_s1 + $0x2c0] sm:$0xff]  ;;  %v422_v8 = vpack.c.bf16 %v102_v1, %v98_v63  ;;  %v360_v9 = vpack.c.bf16 %v109_v3, %v105_v2  ;;  %v106_v11 = vld [vmem:[%s869_s1 + $0x2d0] sm:$0xff]  ;;  %v146_v2 = vlaneseq }
  0x20   :  { %409 = vmatprep.subr.bf16.mxu1 %v408_v28  ;;  %v111_v5 = vld [vmem:[%s869_s1 + $0x2f8] sm:$0xff]  ;;  %v108_v10 = vld [vmem:[%s869_s1 + $0x2e0] sm:$0xff]  ;;  %v110_v12 = vld [vmem:[%s869_s1 + $0x2f0] sm:$0xff] }
  0x21   :  { %v424_v13 = vpack.c.bf16 %v111_v5, %v107_v4  ;;  %v113_v14 = vld [vmem:[%s869_s1 + $0x308] sm:$0xff]  ;;  %v115_v17 = vld [vmem:[%s869_s1 + $0x318] sm:$0xff]  ;;  %v362_v19 = vpack.c.bf16 %v108_v10, %v104_v7  ;;  %v426_v20 = vpack.c.bf16 %v110_v12, %v106_v11  ;;  %v112_v22 = vld [vmem:[%s869_s1 + $0x300] sm:$0xff]  ;;  %v147_v3 = vshrl.u32 %v146_v2, 7 }
  0x22   :  { %347 = vmatpush1.bf16.msra.mxu0 %v346_v34  ;;  %v117_v15 = vld [vmem:[%s869_s1 + $0x328] sm:$0xff]  ;;  %v119_v18 = vld [vmem:[%s869_s1 + $0x338] sm:$0xff]  ;;  %v116_v23 = vld [vmem:[%s869_s1 + $0x320] sm:$0xff] }
  0x23   :  { %411 = vmatpush1.bf16.msra.mxu1 %v410_v35  ;;  %349 = vmatprep.subr.bf16.mxu0 %v348_v36  ;;  %v15_v16 = vld [vmem:[%s870_s0 + $0x8] sm:$0xff]  ;;  %v364_v21 = vpack.c.bf16 %v117_v15, %v113_v14  ;;  %v114_v24 = vld [vmem:[%s869_s1 + $0x310] sm:$0xff]  ;;  %v428_v25 = vpack.c.bf16 %v119_v18, %v115_v17  ;;  %v123_v29 = vld [vmem:[%s869_s1 + $0x358] sm:$0xff]  ;;  %v366_v31 = vpack.c.bf16 %v116_v23, %v112_v22  ;;  %v148_v4 = vsub.s32 0, %v147_v3 }
  0x24   :  { %413 = vmatprep.subr.bf16.mxu1 %v412_v40  ;;  %230 = vmatprep.mubr.f32.mxu0 %v15_v16  ;;  %v118_v26 = vld [vmem:[%s869_s1 + $0x330] sm:$0xff]  ;;  %v121_v27 = vld [vmem:[%s869_s1 + $0x348] sm:$0xff]  ;;  %v127_v30 = vld [vmem:[%s869_s1 + $0x378] sm:$0xff]  ;;  %v152_v7 = vsub.s32 1, %v147_v3 }
  0x25   :  { %301 = vmatprep.mubr.f32.mxu1 %v15_v16  ;;  %v125_v28 = vld [vmem:[%s869_s1 + $0x368] sm:$0xff]  ;;  %v430_v32 = vpack.c.bf16 %v118_v26, %v114_v24  ;;  %v120_v34 = vld [vmem:[%s869_s1 + $0x340] sm:$0xff]  ;;  %v122_v36 = vld [vmem:[%s869_s1 + $0x350] sm:$0xff]  ;;  %v432_v37 = vpack.c.bf16 %v127_v30, %v123_v29 }
  0x26   :  { %351 = vmatpush1.bf16.msra.mxu0 %v350_v46  ;;  %v368_v33 = vpack.c.bf16 %v125_v28, %v121_v27  ;;  %v124_v35 = vld [vmem:[%s869_s1 + $0x360] sm:$0xff]  ;;  %v126_v38 = vld [vmem:[%s869_s1 + $0x370] sm:$0xff]  ;;  %v129_v39 = vld [vmem:[%s869_s1 + $0x388] sm:$0xff] }
  0x27   :  { %415 = vmatpush1.bf16.msra.mxu1 %v414_v47  ;;  %353 = vmatprep.subr.bf16.mxu0 %v352_v48  ;;  %v133_v40 = vld [vmem:[%s869_s1 + $0x3a8] sm:$0xff]  ;;  %v131_v41 = vld [vmem:[%s869_s1 + $0x398] sm:$0xff]  ;;  %v370_v43 = vpack.c.bf16 %v124_v35, %v120_v34  ;;  %v434_v44 = vpack.c.bf16 %v126_v38, %v122_v36  ;;  %v128_v46 = vld [vmem:[%s869_s1 + $0x380] sm:$0xff] }
  0x28   :  { %417 = vmatprep.subr.bf16.mxu1 %v416_v52  ;;  %v135_v42 = vld [vmem:[%s869_s1 + $0x3b8] sm:$0xff]  ;;  %v372_v45 = vpack.c.bf16 %v133_v40, %v129_v39  ;;  %v132_v47 = vld [vmem:[%s869_s1 + $0x3a0] sm:$0xff]  ;;  %v130_v48 = vld [vmem:[%s869_s1 + $0x390] sm:$0xff] }
  0x29   :  { %v436_v49 = vpack.c.bf16 %v135_v42, %v131_v41  ;;  %v134_v50 = vld [vmem:[%s869_s1 + $0x3b0] sm:$0xff]  ;;  %v137_v51 = vld [vmem:[%s869_s1 + $0x3c8] sm:$0xff]  ;;  %v139_v53 = vld [vmem:[%s869_s1 + $0x3d8] sm:$0xff]  ;;  %v374_v55 = vpack.c.bf16 %v132_v47, %v128_v46 }
  0x2a   :  { %355 = vmatpush1.bf16.msra.mxu0 %v354_v58  ;;  %v141_v52 = vld [vmem:[%s869_s1 + $0x3e8] sm:$0xff]  ;;  %v143_v54 = vld [vmem:[%s869_s1 + $0x3f8] sm:$0xff]  ;;  %v438_v56 = vpack.c.bf16 %v134_v50, %v130_v48  ;;  %v136_v58 = vld [vmem:[%s869_s1 + $0x3c0] sm:$0xff] }
  0x2b   :  { %419 = vmatpush1.bf16.msra.mxu1 %v418_v59  ;;  %357 = vmatprep.subr.bf16.mxu0 %v356_v60  ;;  %v376_v57 = vpack.c.bf16 %v141_v52, %v137_v51  ;;  %v140_v59 = vld [vmem:[%s869_s1 + $0x3e0] sm:$0xff]  ;;  %v440_v60 = vpack.c.bf16 %v143_v54, %v139_v53  ;;  %v138_v61 = vld [vmem:[%s869_s1 + $0x3d0] sm:$0xff] }
  0x2c   :  { %421 = vmatprep.subr.bf16.mxu1 %v420_v0  ;;  %v142_v62 = vld [vmem:[%s869_s1 + $0x3f0] sm:$0xff]  ;;  %v378_v63 = vpack.c.bf16 %v140_v59, %v136_v58  ;;  %v14_v1 = vld [vmem:[%s870_s0] sm:$0xff] }
  0x2d   :  { %v442_v0 = vpack.c.bf16 %v142_v62, %v138_v61  ;;  %v144_v5 = vld [vmem:[%s871_s2] sm:$0xf] }
  0x2e   :  { %359 = vmatpush1.bf16.msra.mxu0 %v358_v6  ;;  %v156_v6 = vsub.s32 2, %v147_v3  ;;  %v153_v11 = vrot.slane %v144_v5, %v152_v7 }
  0x2f   :  { %423 = vmatpush1.bf16.msra.mxu1 %v422_v8  ;;  %361 = vmatprep.subr.bf16.mxu0 %v360_v9  ;;  %v160_v8 = vsub.s32 3, %v147_v3  ;;  %v149_v9 = vrot.slane %v144_v5, %v148_v4 }
  0x30   :  { %425 = vmatprep.subr.bf16.mxu1 %v424_v13  ;;  %v157_v10 = vrot.slane %v144_v5, %v156_v6 }
  0x31   :  { %v161_v12 = vrot.slane %v144_v5, %v160_v8 }
  0x32   :  { %363 = vmatpush1.bf16.msra.mxu0 %v362_v19 }
  0x33   :  { %427 = vmatpush1.bf16.msra.mxu1 %v426_v20  ;;  %365 = vmatprep.subr.bf16.mxu0 %v364_v21 }
  0x34   :  { %429 = vmatprep.subr.bf16.mxu1 %v428_v25 }
  0x36   :  { %367 = vmatpush1.bf16.msra.mxu0 %v366_v31 }
  0x37   :  { %431 = vmatpush1.bf16.msra.mxu1 %v430_v32  ;;  %369 = vmatprep.subr.bf16.mxu0 %v368_v33 }
  0x38   :  { %433 = vmatprep.subr.bf16.mxu1 %v432_v37 }
  0x3a   :  { %371 = vmatpush1.bf16.msra.mxu0 %v370_v43 }
  0x3b   :  { %435 = vmatpush1.bf16.msra.mxu1 %v434_v44  ;;  %373 = vmatprep.subr.bf16.mxu0 %v372_v45 }
  0x3c   :  { %437 = vmatprep.subr.bf16.mxu1 %v436_v49 }
  0x3e   :  { %375 = vmatpush1.bf16.msra.mxu0 %v374_v55 }
  0x3f   :  { %439 = vmatpush1.bf16.msra.mxu1 %v438_v56  ;;  %377 = vmatprep.subr.bf16.mxu0 %v376_v57 }
  0x40   :  { %441 = vmatprep.subr.bf16.mxu1 %v440_v60 }
  0x42   :  { %379 = vmatpush1.bf16.msra.mxu0 %v378_v63 }
  0x43   :  { %443 = vmatpush1.bf16.msra.mxu1 %v442_v0 }
  0x45   :  { %231 = vmatmul.mubr.f32.vlgmr.msra.gmra.mrb[0].mxu0 %v14_v1 }
  0x46   :  { %302 = vmatmul.mubr.f32.vlgmr.msra.gmra.mrb[0].mxu1 %v14_v1 }
 0x118   :  { %v232_v13 = vpop.f32.mrb[0].mxu0 }
 0x119   :  { %v233_v14 = vadd.f32 %v232_v13, %v149_v9  ;;  %v303_v15 = vpop.f32.mrb[0].mxu1  ;;  %v234_v16 = vpop.f32.mrb[1].mxu0 }
 0x11a   :  { %v304_v17 = vadd.f32 %v303_v15, %v157_v10  ;;  %v235_v18 = vadd.f32 %v234_v16, %v153_v11  ;;  %v305_v19 = vpop.f32.mrb[1].mxu1 }
 0x11b   :  { %308 = vst [vmem:[%s872_s3] sm:$0xff] %v233_v14  ;;  %v306_v20 = vadd.f32 %v305_v19, %v161_v12 }
 0x11c   :  { %310 = vst [vmem:[%s872_s3 + $0x10] sm:$0xff] %v304_v17  ;;  %309 = vst [vmem:[%s872_s3 + $0x8] sm:$0xff] %v235_v18 }
 0x11d   :  { %311 = vst [vmem:[%s872_s3 + $0x18] sm:$0xff] %v306_v20 }

// kernel: hybrid_forward.8
= control target key start
LH: loop header
LB: loop body
LE: loop exit
PB: predicated region body
PF: predicated region fallthrough
CT: control target
= control target key end

     0   :  { %s647_s12 = smov 0   ;;  %s874_s0 = inlined_call_operand.vmem [shape: f32[2,2048], index: 0, kind: input, shape index: {}]   ;;  %s875_s1 = inlined_call_operand.vmem [shape: f32[128,512], index: 1, kind: input, shape index: {}]   ;;  %s876_s2 = inlined_call_operand.vmem [shape: s32[2,1], index: 2, kind: input, shape index: {}]   ;;  %s877_s3 = inlined_call_operand.vmem [shape: f32[2,512], index: 3, kind: output, shape index: {}]  }
   0x1 LB: > { %s653_s13 = sadd.s32 4294967295, %s621_s12   ;;  %p512_p0 = scmp.ge.s32.totalorder %s621_s12, 1  ;;  %s621_s12 = sphi %s647_s12, %s13_s12  }
   0x2   : > { %p138_p1 = scmp.lt.s32.totalorder %s621_s12, 5 }
   0x4   : > { %p139_p2 = pnand %p512_p0, %p138_p1 }
   0x5   : > { %s513_s14 = sshll.u32 (!%p139_p2), %s653_s13, 2  ;;  %p167_p3 = scmp.lt.s32.totalorder (!%p139_p2), %s653_s13, 3 }
   0x6   : > { %142 = sbr.rel (%p139_p2) target bundleno = 334 (0x14e), region = 32  ;;  %p162_p4 = scmp.lt.s32.totalorder (!%p139_p2), %s513_s14, 15 }
   0x7   : > { %p516_p5 = scmp.ne.s32.totalorder (!%p139_p2), %s653_s13, 0 }
   0xd   : > { %s168_s15 = scalar_select %p167_p3, %s653_s13, 3 }
   0xe   : > { %s879_s14 = smov (!%p162_p4, %s513_s14), 15  ;;  %174 = sbr.rel (%p516_p5) target bundleno = 21 (0x15), region = 36 }
   0xf   : > { %s515_s16 = sshll.u32 %s168_s15, 1  ;;  %s514_s17 = sshll.u32 %s879_s14, 1  ;;  %v623_v0 = vmov (!%p516_p5), 0.0  }
  0x10   : > { %s663_s20 = scalar_lea.vmem %s877_s3, %s515_s16  ;;  %s668_s23 = scalar_lea.vmem %s874_s0, %s514_s17  ;;  %175 = vst [vmem:[#allocation2] sm:$0x3] (!%p516_p5), %v623_v0  ;;  %176 = vst [vmem:[#allocation3] sm:$0x3] (!%p516_p5), %v623_v0 }
  0x15 PF: > { %v180_v1 = vld [vmem:[%s875_s1 + $0x8] sm:$0xff]  ;;  %v182_v3 = vld [vmem:[%s875_s1 + $0x18] sm:$0xff]  ;;  %v179_v6 = vld [vmem:[%s875_s1] sm:$0xff]  ;;  %v624_v8 = vmov 0.0   ;;  %v625_v14 = vmov 0  }
  0x16   : > { %v184_v2 = vld [vmem:[%s875_s1 + $0x28] sm:$0xff]  ;;  %v186_v5 = vld [vmem:[%s875_s1 + $0x38] sm:$0xff]  ;;  %v183_v7 = vld [vmem:[%s875_s1 + $0x20] sm:$0xff]  ;;  %307 = vmatprep.mubr.f32.mxu0 %v624_v8  ;;  %378 = vmatprep.mubr.f32.mxu1 %v624_v8 }
  0x17   : > { %v522_v4 = vpack.c.bf16 %v184_v2, %v180_v1  ;;  %v554_v9 = vpack.c.bf16 %v186_v5, %v182_v3  ;;  %v524_v10 = vpack.c.bf16 %v183_v7, %v179_v6  ;;  %v181_v11 = vld [vmem:[%s875_s1 + $0x10] sm:$0xff]  ;;  %v188_v13 = vld [vmem:[%s875_s1 + $0x48] sm:$0xff]  ;;  %598 = vset.pattern.permute.xlu0 %v625_v14  ;;  %v190_v17 = vld [vmem:[%s875_s1 + $0x58] sm:$0xff] }
  0x18   : > { %v185_v12 = vld [vmem:[%s875_s1 + $0x30] sm:$0xff]  ;;  %v192_v16 = vld [vmem:[%s875_s1 + $0x68] sm:$0xff]  ;;  %v194_v18 = vld [vmem:[%s875_s1 + $0x78] sm:$0xff] }
  0x19   : > { %523 = vmatprep.subr.bf16.mxu0 %v522_v4  ;;  %v556_v15 = vpack.c.bf16 %v185_v12, %v181_v11  ;;  %555 = vmatprep.subr.bf16.mxu1 %v554_v9  ;;  %v526_v19 = vpack.c.bf16 %v192_v16, %v188_v13  ;;  %v558_v20 = vpack.c.bf16 %v194_v18, %v190_v17  ;;  %v187_v21 = vld [vmem:[%s875_s1 + $0x40] sm:$0xff]  ;;  %v189_v23 = vld [vmem:[%s875_s1 + $0x50] sm:$0xff]  ;;  %v196_v26 = vld [vmem:[%s875_s1 + $0x88] sm:$0xff]  ;;  %v441_v13 = vstv %s653_s13 }
  0x1a   : > { %525 = vmatpush1.bf16.msra.mxu0 %v524_v10  ;;  %v191_v22 = vld [vmem:[%s875_s1 + $0x60] sm:$0xff]  ;;  %v193_v25 = vld [vmem:[%s875_s1 + $0x70] sm:$0xff]  ;;  %v200_v27 = vld [vmem:[%s875_s1 + $0xa8] sm:$0xff] }
  0x1b   : > { %557 = vmatpush1.bf16.msra.mxu1 %v556_v15  ;;  %v528_v24 = vpack.c.bf16 %v191_v22, %v187_v21  ;;  %527 = vmatprep.subr.bf16.mxu0 %v526_v19  ;;  %v560_v28 = vpack.c.bf16 %v193_v25, %v189_v23  ;;  %v530_v29 = vpack.c.bf16 %v200_v27, %v196_v26  ;;  %v198_v30 = vld [vmem:[%s875_s1 + $0x98] sm:$0xff]  ;;  %v195_v32 = vld [vmem:[%s875_s1 + $0x80] sm:$0xff]  ;;  %v197_v35 = vld [vmem:[%s875_s1 + $0x90] sm:$0xff] }
  0x1c   : > { %559 = vmatprep.subr.bf16.mxu1 %v558_v20  ;;  %v202_v31 = vld [vmem:[%s875_s1 + $0xb8] sm:$0xff]  ;;  %v199_v34 = vld [vmem:[%s875_s1 + $0xa0] sm:$0xff]  ;;  %v201_v36 = vld [vmem:[%s875_s1 + $0xb0] sm:$0xff] }
  0x1d   : > { %v562_v33 = vpack.c.bf16 %v202_v31, %v198_v30  ;;  %v532_v37 = vpack.c.bf16 %v199_v34, %v195_v32  ;;  %v204_v38 = vld [vmem:[%s875_s1 + $0xc8] sm:$0xff]  ;;  %v206_v40 = vld [vmem:[%s875_s1 + $0xd8] sm:$0xff]  ;;  %v564_v41 = vpack.c.bf16 %v201_v36, %v197_v35  ;;  %v203_v44 = vld [vmem:[%s875_s1 + $0xc0] sm:$0xff] }
  0x1e   : > { %529 = vmatpush1.bf16.msra.mxu0 %v528_v24  ;;  %v208_v39 = vld [vmem:[%s875_s1 + $0xe8] sm:$0xff]  ;;  %v210_v43 = vld [vmem:[%s875_s1 + $0xf8] sm:$0xff]  ;;  %v207_v45 = vld [vmem:[%s875_s1 + $0xe0] sm:$0xff] }
  0x1f   : > { %561 = vmatpush1.bf16.msra.mxu1 %v560_v28  ;;  %531 = vmatprep.subr.bf16.mxu0 %v530_v29  ;;  %v534_v42 = vpack.c.bf16 %v208_v39, %v204_v38  ;;  %v566_v46 = vpack.c.bf16 %v210_v43, %v206_v40  ;;  %v205_v47 = vld [vmem:[%s875_s1 + $0xd0] sm:$0xff]  ;;  %v212_v49 = vld [vmem:[%s875_s1 + $0x108] sm:$0xff]  ;;  %v214_v51 = vld [vmem:[%s875_s1 + $0x118] sm:$0xff]  ;;  %v536_v53 = vpack.c.bf16 %v207_v45, %v203_v44  ;;  %v626_v39 = vmov 1983009808  }
  0x20   : > { %563 = vmatprep.subr.bf16.mxu1 %v562_v33  ;;  %v209_v48 = vld [vmem:[%s875_s1 + $0xf0] sm:$0xff]  ;;  %v216_v50 = vld [vmem:[%s875_s1 + $0x128] sm:$0xff]  ;;  %v218_v52 = vld [vmem:[%s875_s1 + $0x138] sm:$0xff]  ;;  %v392_v40 = vunpack.c.l.s4 %v626_v39 }
  0x21   : > { %v568_v54 = vpack.c.bf16 %v209_v48, %v205_v47  ;;  %v538_v55 = vpack.c.bf16 %v216_v50, %v212_v49  ;;  %v211_v56 = vld [vmem:[%s875_s1 + $0x100] sm:$0xff]  ;;  %v213_v58 = vld [vmem:[%s875_s1 + $0x110] sm:$0xff]  ;;  %v570_v59 = vpack.c.bf16 %v218_v52, %v214_v51  ;;  %v220_v61 = vld [vmem:[%s875_s1 + $0x148] sm:$0xff] }
  0x22   : > { %533 = vmatpush1.bf16.msra.mxu0 %v532_v37  ;;  %v215_v57 = vld [vmem:[%s875_s1 + $0x120] sm:$0xff]  ;;  %v217_v60 = vld [vmem:[%s875_s1 + $0x130] sm:$0xff]  ;;  %v224_v62 = vld [vmem:[%s875_s1 + $0x168] sm:$0xff] }
  0x23   : > { %565 = vmatpush1.bf16.msra.mxu1 %v564_v41  ;;  %535 = vmatprep.subr.bf16.mxu0 %v534_v42  ;;  %v222_v63 = vld [vmem:[%s875_s1 + $0x158] sm:$0xff]  ;;  %v540_v1 = vpack.c.bf16 %v215_v57, %v211_v56  ;;  %v572_v2 = vpack.c.bf16 %v217_v60, %v213_v58  ;;  %v542_v3 = vpack.c.bf16 %v224_v62, %v220_v61  ;;  %v219_v4 = vld [vmem:[%s875_s1 + $0x140] sm:$0xff]  ;;  %v221_v6 = vld [vmem:[%s875_s1 + $0x150] sm:$0xff]  ;;  %v394_v41 = vlaneseq }
  0x24   : > { %567 = vmatprep.subr.bf16.mxu1 %v566_v46  ;;  %v226_v0 = vld [vmem:[%s875_s1 + $0x178] sm:$0xff]  ;;  %v223_v5 = vld [vmem:[%s875_s1 + $0x160] sm:$0xff]  ;;  %v225_v8 = vld [vmem:[%s875_s1 + $0x170] sm:$0xff]  ;;  %v393_v42 = vunpack.c.0.s8 %v392_v40 }
  0x25   : > { %v574_v7 = vpack.c.bf16 %v226_v0, %v222_v63  ;;  %v228_v9 = vld [vmem:[%s875_s1 + $0x188] sm:$0xff]  ;;  %v230_v11 = vld [vmem:[%s875_s1 + $0x198] sm:$0xff]  ;;  %v544_v15 = vpack.c.bf16 %v223_v5, %v219_v4  ;;  %v227_v16 = vld [vmem:[%s875_s1 + $0x180] sm:$0xff]  ;;  %v576_v17 = vpack.c.bf16 %v225_v8, %v221_v6  ;;  %v395_v43 = vshrl.u32 %v394_v41, 7 }
  0x26   : > { %537 = vmatpush1.bf16.msra.mxu0 %v536_v53  ;;  %v232_v10 = vld [vmem:[%s875_s1 + $0x1a8] sm:$0xff]  ;;  %v234_v12 = vld [vmem:[%s875_s1 + $0x1b8] sm:$0xff]  ;;  %v231_v19 = vld [vmem:[%s875_s1 + $0x1a0] sm:$0xff] }
  0x27   : > { %569 = vmatpush1.bf16.msra.mxu1 %v568_v54  ;;  %539 = vmatprep.subr.bf16.mxu0 %v538_v55  ;;  %v546_v18 = vpack.c.bf16 %v232_v10, %v228_v9  ;;  %v229_v20 = vld [vmem:[%s875_s1 + $0x190] sm:$0xff]  ;;  %v440_v21 = vld [vmem:[%s876_s2] sm:$0x3]  ;;  %v578_v22 = vpack.c.bf16 %v234_v12, %v230_v11  ;;  %v236_v24 = vld [vmem:[%s875_s1 + $0x1c8] sm:$0xff]  ;;  %v548_v29 = vpack.c.bf16 %v231_v19, %v227_v16 }
  0x28   : > { %571 = vmatprep.subr.bf16.mxu1 %v570_v59  ;;  %v233_v23 = vld [vmem:[%s875_s1 + $0x1b0] sm:$0xff]  ;;  %v240_v25 = vld [vmem:[%s875_s1 + $0x1e8] sm:$0xff]  ;;  %vm442_vm0 = vcmp.lt.s32.totalorder %v441_v13, %v440_v21  ;;  %v238_v26 = vld [vmem:[%s875_s1 + $0x1d8] sm:$0xff]  ;;  %v396_v45 = vsub.s32 %v393_v42, %v395_v43 }
  0x29   : > { %v242_v27 = vld [vmem:[%s875_s1 + $0x1f8] sm:$0xff]  ;;  %v443_v28 = vsel %vm442_vm0, 1, %v625_v14  ;;  %v580_v30 = vpack.c.bf16 %v233_v23, %v229_v20  ;;  %v550_v31 = vpack.c.bf16 %v240_v25, %v236_v24  ;;  %v235_v32 = vld [vmem:[%s875_s1 + $0x1c0] sm:$0xff]  ;;  %v237_v14 = vld [vmem:[%s875_s1 + $0x1d0] sm:$0xff] }
  0x2a   : > { %541 = vmatpush1.bf16.msra.mxu0 %v540_v1  ;;  %445 = vperm.xlu0 %598, %v443_v28   ;;  %v239_v33 = vld [vmem:[%s875_s1 + $0x1e0] sm:$0xff]  ;;  %v582_v34 = vpack.c.bf16 %v242_v27, %v238_v26  ;;  %v241_v35 = vld [vmem:[%s875_s1 + $0x1f0] sm:$0xff] }
  0x2b   : > { %573 = vmatpush1.bf16.msra.mxu1 %v572_v2  ;;  %543 = vmatprep.subr.bf16.mxu0 %v542_v3  ;;  %v552_v36 = vpack.c.bf16 %v239_v33, %v235_v32  ;;  %v584_v37 = vpack.c.bf16 %v241_v35, %v237_v14  ;;  %v178_v38 = vld [vmem:[#allocation2] sm:$0x3]  ;;  %v177_v53 = vld [vmem:[%s668_s23] sm:$0xff]  ;;  %v434_v4 = vld [vmem:[#allocation3] sm:$0x3] }
  0x2c   : > { %575 = vmatprep.subr.bf16.mxu1 %v574_v7  ;;  %v450_v11 = vld [vmem:[#allocation3] sm:$0x3] }
  0x2e   : > { %545 = vmatpush1.bf16.msra.mxu0 %v544_v15 }
  0x2f   : > { %577 = vmatpush1.bf16.msra.mxu1 %v576_v17  ;;  %547 = vmatprep.subr.bf16.mxu0 %v546_v18 }
  0x30   : > { %579 = vmatprep.subr.bf16.mxu1 %v578_v22 }
  0x32   : > { %549 = vmatpush1.bf16.msra.mxu0 %v548_v29 }
  0x33   : > { %581 = vmatpush1.bf16.msra.mxu1 %v580_v30  ;;  %551 = vmatprep.subr.bf16.mxu0 %v550_v31 }
  0x34   : > { %583 = vmatprep.subr.bf16.mxu1 %v582_v34 }
  0x36   : > { %553 = vmatpush1.bf16.msra.mxu0 %v552_v36 }
  0x37   : > { %585 = vmatpush1.bf16.msra.mxu1 %v584_v37 }
  0x39   : > { %308 = vmatmul.mubr.f32.vlgmr.msra.gmra.mrb[0].mxu0 %v178_v38 }
  0x3a   : > { %379 = vmatmul.mubr.f32.vlgmr.msra.gmra.mrb[0].mxu1 %v178_v38 }
  0xa9   : > { %v446_v6 = vpop.permute.xlu0 %445 }
  0xaa   : > { %vm447_vm1 = vcmp.eq.s32.totalorder %v446_v6, 1 }
 0x10c   : > { %v309_v44 = vpop.f32.mrb[0].mxu0 }
 0x10d   : > { %v380_v46 = vpop.f32.mrb[0].mxu1  ;;  %v311_v47 = vpop.f32.mrb[1].mxu0 }
 0x10e   : > { %v389_v48 = vcombine.low %v309_v44, %v311_v47  ;;  %v382_v49 = vpop.f32.mrb[1].mxu1 }
 0x10f   : > { %v390_v50 = vcombine.low %v380_v46, %v382_v49 }
 0x110   : > { %v397_v51 = vrot.slane %v389_v48, %v396_v45 }
 0x111   : > { %v404_v52 = vrot.slane %v390_v50, %v396_v45 }
 0x113   : > { %v405_v54 = vcombine.low %v397_v51, %v404_v52 }
 0x115   : > { %v407_v55 = vadd.f32 %v405_v54, %v177_v53 }
 0x117   : > { %v517_v56 = vmul.f32 -1.442695, %v407_v55  ;;  %v415_v57 = vrot.slane %v407_v55, 2  ;;  %v426_v59 = vrot.slane %v407_v55, 6  ;;  %v423_v62 = vrot.slane %v407_v55, 4 }
 0x119   : > { %599 = vpow2.f32 %v517_v56  ;;  %v518_v58 = vmul.f32 -1.442695, %v415_v57  ;;  %v519_v60 = vmul.f32 -1.442695, %v426_v59 }
 0x11b   : > { %601 = vpow2.f32 %v518_v58 }
 0x11c   : > { %603 = vpow2.f32 %v519_v60 }
 0x123   : > { %v600_v61 = vpop.eup %599 }
 0x124   : > { %v411_v63 = vadd.f32 1.0, %v600_v61 }
 0x125   : > { %v602_v0 = vpop.eup %601 }
 0x126   : > { %605 = vrcp.f32 %v411_v63  ;;  %v420_v1 = vadd.f32 1.0, %v602_v0  ;;  %v604_v2 = vpop.eup %603 }
 0x127   : > { %607 = vtanh.f32 %v423_v62  ;;  %v431_v8 = vadd.f32 1.0, %v604_v2 }
 0x128   : > { %609 = vrcp.f32 %v420_v1 }
 0x129   : > { %611 = vrcp.f32 %v431_v8 }
 0x130   : > { %v606_v3 = vpop.eup %605 }
 0x131   : > { %v608_v5 = vpop.eup %607 }
 0x132   : > { %v610_v7 = vpop.eup %609  ;;  %v436_v10 = vmul.f32 %v608_v5, %v606_v3 }
 0x133   : > { %v435_v9 = vmul.f32 %v610_v7, %v434_v4  ;;  %v612_v15 = vpop.eup %611 }
 0x135   : > { %v437_v12 = vadd.f32 %v436_v10, %v435_v9 }
 0x137   : > { %613 = vtanh.f32 %v437_v12  ;;  %v451_v13 = vsel %vm447_vm1, %v437_v12, %v450_v11 }
 0x138   : > { %452 = vst [vmem:[#allocation3] sm:$0x3] %v451_v13 }
 0x141   : > { %v614_v16 = vpop.eup %613 }
 0x142   : > { %v439_v17 = vmul.f32 %v614_v16, %v612_v15 }
 0x144   : > { %v448_v18 = vsel %vm447_vm1, %v439_v17, %v178_v38 }
 0x145   : > { %449 = vst [vmem:[#allocation2] sm:$0x3] %v448_v18 }
 0x14c   : > { %v453_v19 = vld [vmem:[#allocation2] sm:$0x3] }
 0x14d   : > { %454 = vst [vmem:[%s663_s20] sm:$0x3] %v453_v19 }
 0x14e PF: > { %s13_s12 = sadd.s32 1, %s621_s12  }
 0x14f   : > { %p10_p6 = scmp.ge.s32.totalorder %s13_s12, 6  }
 0x151   :  { %12 = sbr.rel (!%p10_p6) target bundleno = 1 (0x1), region = 66 }

// kernel: hybrid_forward.11
= control target key start
LH: loop header
LB: loop body
LE: loop exit
PB: predicated region body
PF: predicated region fallthrough
CT: control target
= control target key end

     0   :  { %v229_v3 = vmov 0.0|0.0   ;;  %vm230_vm0 = vmmov 0   ;;  %v231_v6 = vmov 0.0   ;;  %s319_s0 = inlined_call_operand.vmem [shape: f32[8,128], index: 0, kind: input, shape index: {}]   ;;  %s320_s1 = inlined_call_operand.vmem [shape: f32[128,128], index: 1, kind: input, shape index: {}]   ;;  %s321_s2 = inlined_call_operand.vmem [shape: f32[1,128], index: 2, kind: input, shape index: {}]   ;;  %s322_s3 = inlined_call_operand.hbm [shape: f32[8,128], index: 3, kind: output, shape index: {}]  }
   0x1   :  { %v16_v0 = vld [vmem:[%s320_s1] sm:$0xff]  ;;  %v17_v1 = vld [vmem:[%s320_s1 + $0x8] sm:$0xff]  ;;  %v18_v2 = vld [vmem:[%s320_s1 + $0x10] sm:$0xff]  ;;  %177 = vmatprep.subr.bf16.mxu0 %v229_v3  ;;  %174 = vmatprep.mubr.msk.f32.mxu0 %vm230_vm0, %v231_v6 }
   0x2   :  { %v178_v4 = vpack.c.bf16 %v17_v1, %v16_v0  ;;  %v19_v5 = vld [vmem:[%s320_s1 + $0x18] sm:$0xff]  ;;  %v20_v8 = vld [vmem:[%s320_s1 + $0x20] sm:$0xff]  ;;  %v21_v9 = vld [vmem:[%s320_s1 + $0x28] sm:$0xff] }
   0x3   :  { %v181_v7 = vpack.c.bf16 %v19_v5, %v18_v2 }
   0x4   :  { %179 = vmatpush3.bf16.msra.mxu0 %v178_v4 }
   0x5   :  { %180 = vmatprep.subr.bf16.mxu0 %v229_v3 }
   0x6   :  { %8 = vsyncpa [#allocation3], 0  ;;  %v184_v10 = vpack.c.bf16 %v21_v9, %v20_v8  ;;  %v22_v11 = vld [vmem:[%s320_s1 + $0x30] sm:$0xff]  ;;  %v23_v12 = vld [vmem:[%s320_s1 + $0x38] sm:$0xff]  ;;  %s232_s21 = smov [#allocation2]  }
   0x7   :  { %v187_v13 = vpack.c.bf16 %v23_v12, %v22_v11  ;;  %v24_v14 = vld [vmem:[%s320_s1 + $0x40] sm:$0xff]  ;;  %v25_v15 = vld [vmem:[%s320_s1 + $0x48] sm:$0xff]  ;;  %v26_v17 = vld [vmem:[%s320_s1 + $0x50] sm:$0xff]  ;;  %s116_s22 = sshll.u32 %s232_s21, 4  ;;  %s117_s22 = int_to_ptr.vmem [resolvable:$true] %s116_s22 }
   0x8   :  { %182 = vmatpush3.bf16.msra.mxu0 %v181_v7  ;;  %v190_v16 = vpack.c.bf16 %v25_v15, %v24_v14  ;;  %v27_v18 = vld [vmem:[%s320_s1 + $0x58] sm:$0xff]  ;;  %v28_v20 = vld [vmem:[%s320_s1 + $0x60] sm:$0xff]  ;;  %v29_v21 = vld [vmem:[%s320_s1 + $0x68] sm:$0xff]  ;;  %p210_p1 = scmp.lt.s32.totalorder %s117_s22, %s117_s22 }
   0x9   :  { %183 = vmatprep.subr.bf16.mxu0 %v229_v3  ;;  %v193_v19 = vpack.c.bf16 %v27_v18, %v26_v17  ;;  %v196_v22 = vpack.c.bf16 %v29_v21, %v28_v20  ;;  %v30_v23 = vld [vmem:[%s320_s1 + $0x70] sm:$0xff]  ;;  %v31_v24 = vld [vmem:[%s320_s1 + $0x78] sm:$0xff]  ;;  %v15_v26 = vld [vmem:[%s319_s0] sm:$0xff]  ;;  %s205_s1 = scalar_lea.vmem %s117_s22, 128 }
   0xa   :  { %v199_v25 = vpack.c.bf16 %v31_v24, %v30_v23  ;;  %v124_v27 = vld [vmem:[%s321_s2] ss:$0 sm:$0xff]  ;;  %p206_p0 = scmp.ne.s32.totalorder %s117_s22, %s205_s1  ;;  %p211_p2 = scmp.lt.s32.totalorder %s205_s1, %s205_s1 }
   0xc   :  { %185 = vmatpush3.bf16.msra.mxu0 %v184_v10  ;;  %p212_p3 = por %p211_p2, %p210_p1 }
   0xd   :  { %186 = vmatprep.subr.bf16.mxu0 %v229_v3 }
   0xe   :  { %p213_p4 = pnand %p212_p3, %p206_p0 }
  0x10   :  { %188 = vmatpush3.bf16.msra.mxu0 %v187_v13 }
  0x11   :  { %189 = vmatprep.subr.bf16.mxu0 %v229_v3 }
  0x14   :  { %191 = vmatpush3.bf16.msra.mxu0 %v190_v16 }
  0x15   :  { %192 = vmatprep.subr.bf16.mxu0 %v229_v3 }
  0x18   :  { %194 = vmatpush3.bf16.msra.mxu0 %v193_v19 }
  0x19   :  { %195 = vmatprep.subr.bf16.mxu0 %v229_v3 }
  0x1c   :  { %197 = vmatpush3.bf16.msra.mxu0 %v196_v22 }
  0x1d   :  { %198 = vmatprep.subr.bf16.mxu0 %v229_v3 }
  0x20   :  { %200 = vmatpush3.bf16.msra.mxu0 %v199_v25 }
  0x23   :  { %175 = vmatmul.mubr.f32.vlgmr.msra.gmra.mrb[0].mxu0 %v15_v26 }
  0xf6   :  { %v105_v28 = vpop.f32.mrb[0].mxu0 }
  0xf7   :  { %v106_v29 = vadd.f32 %v124_v27, %v105_v28  ;;  %v176_v30 = vpop.f32.mrb[1].mxu0 }
  0xf9   :  { %109 = vst [vmem:[#allocation2] sm:$0xff] %v106_v29 }
  0xfa   :  { %216 = shalt.err (!%p213_p4)
}
  0xfb   :  { %s217_s24 = scalar_lea.hbm %s322_s3, 128 }
  0xfc   :  { %p218_p5 = scmp.ne.s32.totalorder %s322_s3, %s217_s24  ;;  %p221_p6 = scmp.lt.u32.totalorder %s217_s24, %s322_s3 }
  0xfe   :  { %p223_p7 = pnand %p221_p6, %p218_p5 }
 0x100   :  { %226 = shalt.err (!%p223_p7)
}
 0x101   :  { %119 = dma.vmem_to_hbm [thread:$0]  %s117_s22, 128, %s322_s3, [#allocation3]  }
 0x102   :  { %227 = dma.done.wait [#allocation3], 128  }
 0x103   :  { %228 = vsyncadd [#allocation3], 4294967168 }
 0x104   :  { %123 = vsyncpa [#allocation3], 1 }

// kernel: hybrid_forward.9
= control target key start
LH: loop header
LB: loop body
LE: loop exit
PB: predicated region body
PF: predicated region fallthrough
CT: control target
= control target key end

     0   :  { %v316_v3 = vmov 0.0   ;;  %s547_s1 = inlined_call_operand.vmem [shape: f32[128,512], index: 1, kind: input, shape index: {}]   ;;  %s548_s0 = inlined_call_operand.vmem [shape: f32[8,128], index: 0, kind: input, shape index: {}]   ;;  %s549_s2 = inlined_call_operand.vmem [shape: f32[1,512], index: 2, kind: input, shape index: {}]   ;;  %s550_s3 = inlined_call_operand.vmem [shape: f32[8,512], index: 3, kind: output, shape index: {}]  }
   0x1   :  { %v16_v0 = vld [vmem:[%s547_s1 + $0x8] sm:$0xff]  ;;  %v18_v2 = vld [vmem:[%s547_s1 + $0x18] sm:$0xff]  ;;  %165 = vmatprep.mubr.f32.mxu0 %v316_v3  ;;  %236 = vmatprep.mubr.f32.mxu1 %v316_v3  ;;  %v15_v6 = vld [vmem:[%s547_s1] sm:$0xff] }
   0x2   :  { %v20_v1 = vld [vmem:[%s547_s1 + $0x28] sm:$0xff]  ;;  %v22_v5 = vld [vmem:[%s547_s1 + $0x38] sm:$0xff]  ;;  %v19_v7 = vld [vmem:[%s547_s1 + $0x20] sm:$0xff] }
   0x3   :  { %v251_v4 = vpack.c.bf16 %v20_v1, %v16_v0  ;;  %v283_v8 = vpack.c.bf16 %v22_v5, %v18_v2  ;;  %v253_v9 = vpack.c.bf16 %v19_v7, %v15_v6  ;;  %v17_v10 = vld [vmem:[%s547_s1 + $0x10] sm:$0xff]  ;;  %v24_v12 = vld [vmem:[%s547_s1 + $0x48] sm:$0xff]  ;;  %v26_v15 = vld [vmem:[%s547_s1 + $0x58] sm:$0xff] }
   0x4   :  { %v21_v11 = vld [vmem:[%s547_s1 + $0x30] sm:$0xff]  ;;  %v28_v14 = vld [vmem:[%s547_s1 + $0x68] sm:$0xff]  ;;  %v30_v16 = vld [vmem:[%s547_s1 + $0x78] sm:$0xff] }
   0x5   :  { %252 = vmatprep.subr.bf16.mxu0 %v251_v4  ;;  %v285_v13 = vpack.c.bf16 %v21_v11, %v17_v10  ;;  %284 = vmatprep.subr.bf16.mxu1 %v283_v8  ;;  %v255_v17 = vpack.c.bf16 %v28_v14, %v24_v12  ;;  %v287_v18 = vpack.c.bf16 %v30_v16, %v26_v15  ;;  %v23_v19 = vld [vmem:[%s547_s1 + $0x40] sm:$0xff]  ;;  %v25_v21 = vld [vmem:[%s547_s1 + $0x50] sm:$0xff]  ;;  %v32_v24 = vld [vmem:[%s547_s1 + $0x88] sm:$0xff] }
   0x6   :  { %254 = vmatpush1.bf16.msra.mxu0 %v253_v9  ;;  %v27_v20 = vld [vmem:[%s547_s1 + $0x60] sm:$0xff]  ;;  %v29_v23 = vld [vmem:[%s547_s1 + $0x70] sm:$0xff]  ;;  %v36_v25 = vld [vmem:[%s547_s1 + $0xa8] sm:$0xff] }
   0x7   :  { %286 = vmatpush1.bf16.msra.mxu1 %v285_v13  ;;  %v257_v22 = vpack.c.bf16 %v27_v20, %v23_v19  ;;  %256 = vmatprep.subr.bf16.mxu0 %v255_v17  ;;  %v289_v26 = vpack.c.bf16 %v29_v23, %v25_v21  ;;  %v259_v27 = vpack.c.bf16 %v36_v25, %v32_v24  ;;  %v34_v28 = vld [vmem:[%s547_s1 + $0x98] sm:$0xff]  ;;  %v31_v30 = vld [vmem:[%s547_s1 + $0x80] sm:$0xff]  ;;  %v33_v33 = vld [vmem:[%s547_s1 + $0x90] sm:$0xff] }
   0x8   :  { %288 = vmatprep.subr.bf16.mxu1 %v287_v18  ;;  %v38_v29 = vld [vmem:[%s547_s1 + $0xb8] sm:$0xff]  ;;  %v35_v32 = vld [vmem:[%s547_s1 + $0xa0] sm:$0xff]  ;;  %v37_v34 = vld [vmem:[%s547_s1 + $0xb0] sm:$0xff] }
   0x9   :  { %v291_v31 = vpack.c.bf16 %v38_v29, %v34_v28  ;;  %v261_v35 = vpack.c.bf16 %v35_v32, %v31_v30  ;;  %v40_v36 = vld [vmem:[%s547_s1 + $0xc8] sm:$0xff]  ;;  %v42_v38 = vld [vmem:[%s547_s1 + $0xd8] sm:$0xff]  ;;  %v293_v39 = vpack.c.bf16 %v37_v34, %v33_v33  ;;  %v39_v42 = vld [vmem:[%s547_s1 + $0xc0] sm:$0xff]  ;;  %v81_v34 = vlaneseq }
   0xa   :  { %258 = vmatpush1.bf16.msra.mxu0 %v257_v22  ;;  %v44_v37 = vld [vmem:[%s547_s1 + $0xe8] sm:$0xff]  ;;  %v46_v41 = vld [vmem:[%s547_s1 + $0xf8] sm:$0xff]  ;;  %v43_v43 = vld [vmem:[%s547_s1 + $0xe0] sm:$0xff] }
   0xb   :  { %290 = vmatpush1.bf16.msra.mxu1 %v289_v26  ;;  %260 = vmatprep.subr.bf16.mxu0 %v259_v27  ;;  %v263_v40 = vpack.c.bf16 %v44_v37, %v40_v36  ;;  %v295_v44 = vpack.c.bf16 %v46_v41, %v42_v38  ;;  %v41_v45 = vld [vmem:[%s547_s1 + $0xd0] sm:$0xff]  ;;  %v48_v47 = vld [vmem:[%s547_s1 + $0x108] sm:$0xff]  ;;  %v50_v49 = vld [vmem:[%s547_s1 + $0x118] sm:$0xff]  ;;  %v265_v51 = vpack.c.bf16 %v43_v43, %v39_v42 }
   0xc   :  { %292 = vmatprep.subr.bf16.mxu1 %v291_v31  ;;  %v45_v46 = vld [vmem:[%s547_s1 + $0xf0] sm:$0xff]  ;;  %v52_v48 = vld [vmem:[%s547_s1 + $0x128] sm:$0xff]  ;;  %v54_v50 = vld [vmem:[%s547_s1 + $0x138] sm:$0xff] }
   0xd   :  { %v297_v52 = vpack.c.bf16 %v45_v46, %v41_v45  ;;  %v267_v53 = vpack.c.bf16 %v52_v48, %v48_v47  ;;  %v47_v54 = vld [vmem:[%s547_s1 + $0x100] sm:$0xff]  ;;  %v49_v56 = vld [vmem:[%s547_s1 + $0x110] sm:$0xff]  ;;  %v299_v57 = vpack.c.bf16 %v54_v50, %v50_v49  ;;  %v56_v59 = vld [vmem:[%s547_s1 + $0x148] sm:$0xff] }
   0xe   :  { %262 = vmatpush1.bf16.msra.mxu0 %v261_v35  ;;  %v51_v55 = vld [vmem:[%s547_s1 + $0x120] sm:$0xff]  ;;  %v53_v58 = vld [vmem:[%s547_s1 + $0x130] sm:$0xff]  ;;  %v60_v60 = vld [vmem:[%s547_s1 + $0x168] sm:$0xff]  ;;  %v82_v35 = vshrl.u32 %v81_v34, 7 }
   0xf   :  { %294 = vmatpush1.bf16.msra.mxu1 %v293_v39  ;;  %264 = vmatprep.subr.bf16.mxu0 %v263_v40  ;;  %v58_v61 = vld [vmem:[%s547_s1 + $0x158] sm:$0xff]  ;;  %v269_v63 = vpack.c.bf16 %v51_v55, %v47_v54  ;;  %v301_v0 = vpack.c.bf16 %v53_v58, %v49_v56  ;;  %v271_v1 = vpack.c.bf16 %v60_v60, %v56_v59  ;;  %v55_v2 = vld [vmem:[%s547_s1 + $0x140] sm:$0xff]  ;;  %v57_v4 = vld [vmem:[%s547_s1 + $0x150] sm:$0xff] }
  0x10   :  { %296 = vmatprep.subr.bf16.mxu1 %v295_v44  ;;  %v62_v62 = vld [vmem:[%s547_s1 + $0x178] sm:$0xff]  ;;  %v59_v3 = vld [vmem:[%s547_s1 + $0x160] sm:$0xff]  ;;  %v61_v6 = vld [vmem:[%s547_s1 + $0x170] sm:$0xff]  ;;  %v83_v36 = vsub.s32 0, %v82_v35  ;;  %v91_v38 = vsub.s32 2, %v82_v35  ;;  %v87_v39 = vsub.s32 1, %v82_v35 }
  0x11   :  { %v303_v5 = vpack.c.bf16 %v62_v62, %v58_v61  ;;  %v64_v7 = vld [vmem:[%s547_s1 + $0x188] sm:$0xff]  ;;  %v66_v9 = vld [vmem:[%s547_s1 + $0x198] sm:$0xff]  ;;  %v273_v11 = vpack.c.bf16 %v59_v3, %v55_v2  ;;  %v305_v12 = vpack.c.bf16 %v61_v6, %v57_v4  ;;  %v63_v14 = vld [vmem:[%s547_s1 + $0x180] sm:$0xff]  ;;  %v95_v40 = vsub.s32 3, %v82_v35 }
  0x12   :  { %266 = vmatpush1.bf16.msra.mxu0 %v265_v51  ;;  %v68_v8 = vld [vmem:[%s547_s1 + $0x1a8] sm:$0xff]  ;;  %v70_v10 = vld [vmem:[%s547_s1 + $0x1b8] sm:$0xff]  ;;  %v67_v15 = vld [vmem:[%s547_s1 + $0x1a0] sm:$0xff] }
  0x13   :  { %298 = vmatpush1.bf16.msra.mxu1 %v297_v52  ;;  %268 = vmatprep.subr.bf16.mxu0 %v267_v53  ;;  %v275_v13 = vpack.c.bf16 %v68_v8, %v64_v7  ;;  %v65_v16 = vld [vmem:[%s547_s1 + $0x190] sm:$0xff]  ;;  %v307_v17 = vpack.c.bf16 %v70_v10, %v66_v9  ;;  %v72_v19 = vld [vmem:[%s547_s1 + $0x1c8] sm:$0xff]  ;;  %v74_v21 = vld [vmem:[%s547_s1 + $0x1d8] sm:$0xff]  ;;  %v277_v23 = vpack.c.bf16 %v67_v15, %v63_v14 }
  0x14   :  { %300 = vmatprep.subr.bf16.mxu1 %v299_v57  ;;  %v69_v18 = vld [vmem:[%s547_s1 + $0x1b0] sm:$0xff]  ;;  %v76_v20 = vld [vmem:[%s547_s1 + $0x1e8] sm:$0xff]  ;;  %v78_v22 = vld [vmem:[%s547_s1 + $0x1f8] sm:$0xff] }
  0x15   :  { %v309_v24 = vpack.c.bf16 %v69_v18, %v65_v16  ;;  %v279_v25 = vpack.c.bf16 %v76_v20, %v72_v19  ;;  %v71_v26 = vld [vmem:[%s547_s1 + $0x1c0] sm:$0xff]  ;;  %v311_v28 = vpack.c.bf16 %v78_v22, %v74_v21  ;;  %v73_v29 = vld [vmem:[%s547_s1 + $0x1d0] sm:$0xff] }
  0x16   :  { %270 = vmatpush1.bf16.msra.mxu0 %v269_v63  ;;  %v75_v27 = vld [vmem:[%s547_s1 + $0x1e0] sm:$0xff]  ;;  %v77_v30 = vld [vmem:[%s547_s1 + $0x1f0] sm:$0xff] }
  0x17   :  { %302 = vmatpush1.bf16.msra.mxu1 %v301_v0  ;;  %272 = vmatprep.subr.bf16.mxu0 %v271_v1  ;;  %v281_v31 = vpack.c.bf16 %v75_v27, %v71_v26  ;;  %v313_v32 = vpack.c.bf16 %v77_v30, %v73_v29  ;;  %v14_v33 = vld [vmem:[%s548_s0] sm:$0xff] }
  0x18   :  { %304 = vmatprep.subr.bf16.mxu1 %v303_v5  ;;  %v79_v37 = vld [vmem:[%s549_s2] sm:$0xf] }
  0x19   :  { %v84_v41 = vrot.slane %v79_v37, %v83_v36  ;;  %v92_v42 = vrot.slane %v79_v37, %v91_v38  ;;  %v88_v43 = vrot.slane %v79_v37, %v87_v39  ;;  %v96_v44 = vrot.slane %v79_v37, %v95_v40 }
  0x1a   :  { %274 = vmatpush1.bf16.msra.mxu0 %v273_v11 }
  0x1b   :  { %306 = vmatpush1.bf16.msra.mxu1 %v305_v12  ;;  %276 = vmatprep.subr.bf16.mxu0 %v275_v13 }
  0x1c   :  { %308 = vmatprep.subr.bf16.mxu1 %v307_v17 }
  0x1e   :  { %278 = vmatpush1.bf16.msra.mxu0 %v277_v23 }
  0x1f   :  { %310 = vmatpush1.bf16.msra.mxu1 %v309_v24  ;;  %280 = vmatprep.subr.bf16.mxu0 %v279_v25 }
  0x20   :  { %312 = vmatprep.subr.bf16.mxu1 %v311_v28 }
  0x22   :  { %282 = vmatpush1.bf16.msra.mxu0 %v281_v31 }
  0x23   :  { %314 = vmatpush1.bf16.msra.mxu1 %v313_v32 }
  0x25   :  { %166 = vmatmul.mubr.f32.vlgmr.msra.gmra.mrb[0].mxu0 %v14_v33 }
  0x26   :  { %237 = vmatmul.mubr.f32.vlgmr.msra.gmra.mrb[0].mxu1 %v14_v33 }
  0xf8   :  { %v167_v45 = vpop.f32.mrb[0].mxu0 }
  0xf9   :  { %v168_v46 = vadd.f32 %v167_v45, %v84_v41  ;;  %v238_v47 = vpop.f32.mrb[0].mxu1  ;;  %v169_v48 = vpop.f32.mrb[1].mxu0 }
  0xfa   :  { %v239_v49 = vadd.f32 %v238_v47, %v92_v42  ;;  %v170_v50 = vadd.f32 %v169_v48, %v88_v43  ;;  %v240_v51 = vpop.f32.mrb[1].mxu1 }
  0xfb   :  { %243 = vst [vmem:[%s550_s3] sm:$0xff] %v168_v46  ;;  %v241_v52 = vadd.f32 %v240_v51, %v96_v44 }
  0xfc   :  { %245 = vst [vmem:[%s550_s3 + $0x10] sm:$0xff] %v239_v49  ;;  %244 = vst [vmem:[%s550_s3 + $0x8] sm:$0xff] %v170_v50 }
  0xfd   :  { %246 = vst [vmem:[%s550_s3 + $0x18] sm:$0xff] %v241_v52 }

</bundles_post_ra>
